<compile_context>
chip_gen: v6e
topology: v6e:2x2x1
jax: 0.10.0
libtpu: 0.0.40
codegen_flags: <defaults>
</compile_context>

<pallas_src>
from functools import partial

import jax
import jax.numpy as jnp
from jax.experimental import pallas as pl
from jax.experimental.pallas import tpu as pltpu


def _round_up(v, m):
    return ((v + m - 1) // m) * m


def _pg_head_kernel(*refs, layer_dims, base, hw_c, taps):
    """Fused per-level PGHead.

    refs: x_ref, mask_ref, (w_0, b_0), ..., (w_{L-1}, b_{L-1}), o_ref,
          buf0, buf1
      x_ref   : (Cin0_p, Wb)       zero-margined, padded-flattened input plane
      mask_ref: (1, hw_c)          1.0 on interior (non-padding) pixels
      w_l     : (Cout_p, 9*Cin_p)  tap-stacked weights (tap-major, chan-minor)
      b_l     : (Cout_p, 1)        bias (f32)
      o_ref   : (Cpred_p, hw_c)    pred-conv output on the padded-flat grid
      buf0/1  : (Cmax_p, Wb)       VMEM ping-pong activation planes
    """
    num_layers = len(layer_dims)
    x_ref, mask_ref = refs[0], refs[1]
    w_refs = refs[2:2 + 2 * num_layers:2]
    b_refs = refs[3:3 + 2 * num_layers:2]
    o_ref = refs[2 + 2 * num_layers]
    bufs = refs[3 + 2 * num_layers:]

    # Re-zero only the margin lanes of the live scratch planes (interior lanes
    # are fully rewritten every layer).  Done every grid step so each step is
    # independent -> safe under megacore "parallel" sharding of the batch axis.
    n_live = min(2, num_layers - 1)
    for b in bufs[:n_live]:
        rows, wb = b.shape
        b[:, :base] = jnp.zeros((rows, base), b.dtype)
        b[:, base + hw_c:] = jnp.zeros((rows, wb - base - hw_c), b.dtype)

    mask = mask_ref[...]                                   # (1, hw_c) f32
    src_ref = x_ref                                        # 2-D ref view

    for l, (cin_p, cout_p) in enumerate(layer_dims):
        # 9 conv taps = 9 shifted lane-slices; stack them along the
        # contraction dim -> one dense GEMM per layer.
        cols = [src_ref[:cin_p, base + off:base + off + hw_c] for off in taps]
        stacked = jnp.concatenate(cols, axis=0)            # (9*cin_p, hw_c)
        acc = jnp.dot(w_refs[l][...], stacked,
                      preferred_element_type=jnp.float32)  # (cout_p, hw_c)
        acc = acc + b_refs[l][...]                          # bias broadcast

        if l == num_layers - 1:
            o_ref[...] = acc.astype(o_ref.dtype)            # lane-dense store
        else:
            acc = jnp.maximum(acc, 0.0) * mask               # ReLU + re-zero pad
            dst = bufs[l % 2]
            # aligned store: base and hw_c are multiples of 128
            dst[:cout_p, base:base + hw_c] = acc.astype(dst.dtype)
            src_ref = dst


@partial(jax.jit, static_argnames=("compute_dtype",))
def _pg_head_forward_level(x_nchw, weights, biases, *, compute_dtype):
    """Run the whole head (num_convs convs + pred conv) on one FPN level."""
    N, Cin, H, W = x_nchw.shape
    Hp, Wp = H + 2, W + 2
    hw = Hp * Wp                       # padded-flattened plane size
    off = Wp + 1                       # max |tap offset|
    hw_c = _round_up(hw, 128)          # lane-dense compute/output width
    base = _round_up(off, 128)         # left margin (lane aligned)
    Wb = _round_up(base + hw_c + off, 128)
    taps = tuple((ky - 1) * Wp + (kx - 1)
                 for ky in range(3) for kx in range(3))

    num_layers = len(weights)
    layer_dims, w_in, b_in = [], [], []
    for wgt, b in zip(weights, biases):
        cout, cin = int(wgt.shape[0]), int(wgt.shape[1])
        cout_p, cin_p = _round_up(cout, 8), _round_up(cin, 8)
        layer_dims.append((cin_p, cout_p))
        # OIHW -> (O, ky, kx, I) -> pad -> (Cout_p, 9*Cin_p), tap-major layout
        # matching the in-kernel tap stacking order.
        wt = jnp.transpose(wgt, (0, 2, 3, 1))
        wt = jnp.pad(wt, ((0, cout_p - cout), (0, 0), (0, 0),
                          (0, cin_p - cin)))
        w_in.append(wt.reshape(cout_p, 9 * cin_p).astype(compute_dtype))
        b_in.append(jnp.pad(b, (0, cout_p - cout)).reshape(cout_p, 1)
                    .astype(jnp.float32))

    cin0_p = layer_dims[0][0]
    cpred = int(weights[-1].shape[0])
    cpred_p = layer_dims[-1][1]
    cmax = max(max([d[1] for d in layer_dims[:-1]], default=8), 8)

    # Input: NCHW -> channel pad -> spatial zero-pad -> flatten -> lane margin.
    xp = jnp.pad(x_nchw, ((0, 0), (0, cin0_p - Cin), (1, 1), (1, 1)))
    xf = xp.reshape(N, cin0_p, hw)
    xm = jnp.pad(xf, ((0, 0), (0, 0), (base, Wb - base - hw)))
    xm = xm.astype(compute_dtype)

    # Interior-pixel mask over the padded-flattened (lane-rounded) plane.
    m2d = jnp.zeros((Hp, Wp), jnp.float32).at[1:H + 1, 1:W + 1].set(1.0)
    mask = jnp.pad(m2d.reshape(1, hw), ((0, 0), (0, hw_c - hw)))

    kernel = partial(_pg_head_kernel, layer_dims=tuple(layer_dims),
                     base=base, hw_c=hw_c, taps=taps)

    in_specs = [pl.BlockSpec((None, cin0_p, Wb), lambda n: (n, 0, 0)),
                pl.BlockSpec((1, hw_c), lambda n: (0, 0))]
    args = [xm, mask]
    for wt, bt in zip(w_in, b_in):
        in_specs.append(pl.BlockSpec(wt.shape, lambda n: (0, 0)))
        in_specs.append(pl.BlockSpec(bt.shape, lambda n: (0, 0)))
        args.extend([wt, bt])

    flops = 2 * N * H * W * 9 * sum(
        int(w.shape[0]) * int(w.shape[1]) for w in weights)
    bytes_accessed = (
        xm.size * xm.dtype.itemsize
        + N * cpred_p * hw_c * 4
        + sum(w.size * w.dtype.itemsize for w in w_in)
        + sum(b.size * 4 for b in b_in))

    out = pl.pallas_call(
        kernel,
        out_shape=jax.ShapeDtypeStruct((N, cpred_p, hw_c), jnp.float32),
        grid=(N,),
        in_specs=in_specs,
        out_specs=pl.BlockSpec((None, cpred_p, hw_c), lambda n: (n, 0, 0)),
        scratch_shapes=[pltpu.VMEM((cmax, Wb), compute_dtype),
                        pltpu.VMEM((cmax, Wb), compute_dtype)],
        compiler_params=pltpu.CompilerParams(
            dimension_semantics=("parallel",)),
        cost_estimate=pl.CostEstimate(
            flops=flops, transcendentals=0,
            bytes_accessed=int(bytes_accessed)),
    )(*args)

    # Un-pad: drop lane rounding, padded border pixels and padded channels.
    out = out[:, :, :hw].reshape(N, cpred_p, Hp, Wp)
    return out[:, :cpred, 1:H + 1, 1:W + 1]          # NCHW, no transpose


def _xavier_normal_conv(key, cin, cout):
    # nn.init.xavier_normal_ on a (Cout, Cin, 3, 3) conv weight.
    std = (2.0 / (cin * 9 + cout * 9)) ** 0.5
    return jax.random.normal(key, (cout, cin, 3, 3), jnp.float32) * std


class PGHeadPallas:
    """JAX/Pallas port of mmrotate PGHead (forward pass only)."""

    def __init__(self, in_channels, conv_channels, num_convs, pred_channels,
                 key, compute_dtype=jnp.float32):
        self.num_convs = num_convs
        self.compute_dtype = compute_dtype
        keys = jax.random.split(key, num_convs + 1)
        self.weights = []          # OIHW, matching nn.Conv2d
        self.biases = []
        channels = in_channels
        for i in range(num_convs):
            self.weights.append(_xavier_normal_conv(keys[i], channels,
                                                    conv_channels))
            self.biases.append(jnp.zeros((conv_channels,), jnp.float32))
            channels = conv_channels
        self.weights.append(_xavier_normal_conv(keys[-1], channels,
                                                pred_channels))
        self.biases.append(jnp.zeros((pred_channels,), jnp.float32))
        # TODO(synk): pred_prior bias-init branch not needed (pred_prior=None).

    def __call__(self, features_nchw):
        w, b = tuple(self.weights), tuple(self.biases)
        return [
            _pg_head_forward_level(feat, w, b,
                                   compute_dtype=self.compute_dtype)
            for feat in features_nchw
        ]


# ----------------------- plain-JAX reference (PyTorch semantics) ------------
def _ref_conv(x_nchw, w_oihw, b, relu):
    y = jax.lax.conv_general_dilated(
        x_nchw, w_oihw, window_strides=(1, 1), padding="SAME",
        dimension_numbers=("NCHW", "OIHW", "NCHW"))
    y = y + b[None, :, None, None]
    return jnp.maximum(y, 0.0) if relu else y


def _ref_forward(head, features_nchw):
    preds = []
    for feat in features_nchw:
        x = feat
        for i in range(head.num_convs):
            x = _ref_conv(x, head.weights[i], head.biases[i], True)
        preds.append(_ref_conv(x, head.weights[-1], head.biases[-1], False))
    return preds


if __name__ == "__main__":
    key = jax.random.PRNGKey(0)
    k_feat0, k_feat1, k_params = jax.random.split(key, 3)

    in_channels, conv_channels, num_convs, pred_channels = 4, 8, 2, 5
    # Two FPN-style feature levels, NCHW (PyTorch convention).
    features = [
        jax.random.normal(k_feat0, (2, in_channels, 16, 16), jnp.float32),
        jax.random.normal(k_feat1, (2, in_channels, 8, 8), jnp.float32),
    ]

    head = PGHeadPallas(in_channels, conv_channels, num_convs, pred_channels,
                        k_params)
    preds = [jax.block_until_ready(p) for p in head(features)]

    refs = _ref_forward(head, features)
    for p, r in zip(preds, refs):
        assert p.shape == r.shape and p.dtype == r.dtype
        assert jnp.allclose(p, r, atol=1e-4, rtol=1e-4), "mismatch vs ref"

    # bf16 MXU-operand path (f32 accumulate) — loose tolerance check.
    head_bf16 = PGHeadPallas(in_channels, conv_channels, num_convs,
                             pred_channels, k_params,
                             compute_dtype=jnp.bfloat16)
    preds_bf16 = [jax.block_until_ready(p) for p in head_bf16(features)]
    for p, r in zip(preds_bf16, refs):
        assert p.shape == r.shape
        assert jnp.allclose(p, r, atol=1e-1, rtol=1e-1), "bf16 path mismatch"

    print("KERNEL_OK")
</pallas_src>

<mosaic_0001>
module attributes {stable_mosaic.version = 11 : i64} {
  func.func @_pg_head_kernel(%arg0: i32, %arg1: memref<1x8x640xf32, #tpu.memory_space<vmem>>, %arg2: memref<1x384xf32, #tpu.memory_space<vmem>>, %arg3: memref<8x72xf32, #tpu.memory_space<vmem>>, %arg4: memref<8x1xf32, #tpu.memory_space<vmem>>, %arg5: memref<8x72xf32, #tpu.memory_space<vmem>>, %arg6: memref<8x1xf32, #tpu.memory_space<vmem>>, %arg7: memref<8x72xf32, #tpu.memory_space<vmem>>, %arg8: memref<8x1xf32, #tpu.memory_space<vmem>>, %arg9: memref<1x8x384xf32, #tpu.memory_space<vmem>>, %arg10: memref<8x640xf32, #tpu.memory_space<vmem>>, %arg11: memref<8x640xf32, #tpu.memory_space<vmem>>) attributes {dimension_semantics = [#tpu.dimension_semantics<parallel>], iteration_bounds = array<i64: 2>, scalar_prefetch = 0 : i64, scratch_operands = 2 : i64, tpu.core_type = #tpu.core_type<tc>, window_params = [{transform_indices = @transform_0, window_bounds = array<i64: 1, 8, 640>}, {pipeline_mode = #tpu.pipeline_mode<synchronous>, transform_indices = @transform_1, window_bounds = array<i64: 1, 384>}, {pipeline_mode = #tpu.pipeline_mode<synchronous>, transform_indices = @transform_2, window_bounds = array<i64: 8, 72>}, {pipeline_mode = #tpu.pipeline_mode<synchronous>, transform_indices = @transform_3, window_bounds = array<i64: 8, 1>}, {pipeline_mode = #tpu.pipeline_mode<synchronous>, transform_indices = @transform_4, window_bounds = array<i64: 8, 72>}, {pipeline_mode = #tpu.pipeline_mode<synchronous>, transform_indices = @transform_5, window_bounds = array<i64: 8, 1>}, {pipeline_mode = #tpu.pipeline_mode<synchronous>, transform_indices = @transform_6, window_bounds = array<i64: 8, 72>}, {pipeline_mode = #tpu.pipeline_mode<synchronous>, transform_indices = @transform_7, window_bounds = array<i64: 8, 1>}, {transform_indices = @transform_8, window_bounds = array<i64: 1, 8, 384>}]} {
    %cst = arith.constant 0.000000e+00 : f32
    %0 = vector.broadcast %cst : f32 to vector<8x128xf32>
    %c0 = arith.constant 0 : index
    %c0_0 = arith.constant 0 : index
    %1 = vector.load %arg10[%c0, %c0_0] : memref<8x640xf32, #tpu.memory_space<vmem>>, vector<8x128xf32>
    tpu.vector_store %arg10[%c0, %c0_0], %0 {strides = array<i32>} : memref<8x640xf32, #tpu.memory_space<vmem>>, vector<8x128xf32>,
    %cst_1 = arith.constant 0.000000e+00 : f32
    %2 = vector.broadcast %cst_1 : f32 to vector<8x128xf32>
    %c0_2 = arith.constant 0 : index
    %c512 = arith.constant 512 : index
    %3 = vector.load %arg10[%c0_2, %c512] : memref<8x640xf32, #tpu.memory_space<vmem>>, vector<8x128xf32>
    tpu.vector_store %arg10[%c0_2, %c512], %2 {strides = array<i32>} : memref<8x640xf32, #tpu.memory_space<vmem>>, vector<8x128xf32>,
    %cst_3 = arith.constant 0.000000e+00 : f32
    %4 = vector.broadcast %cst_3 : f32 to vector<8x128xf32>
    %c0_4 = arith.constant 0 : index
    %c0_5 = arith.constant 0 : index
    %5 = vector.load %arg11[%c0_4, %c0_5] : memref<8x640xf32, #tpu.memory_space<vmem>>, vector<8x128xf32>
    tpu.vector_store %arg11[%c0_4, %c0_5], %4 {strides = array<i32>} : memref<8x640xf32, #tpu.memory_space<vmem>>, vector<8x128xf32>,
    %cst_6 = arith.constant 0.000000e+00 : f32
    %6 = vector.broadcast %cst_6 : f32 to vector<8x128xf32>
    %c0_7 = arith.constant 0 : index
    %c512_8 = arith.constant 512 : index
    %7 = vector.load %arg11[%c0_7, %c512_8] : memref<8x640xf32, #tpu.memory_space<vmem>>, vector<8x128xf32>
    tpu.vector_store %arg11[%c0_7, %c512_8], %6 {strides = array<i32>} : memref<8x640xf32, #tpu.memory_space<vmem>>, vector<8x128xf32>,
    %c0_9 = arith.constant 0 : index
    %c0_10 = arith.constant 0 : index
    %8 = vector.load %arg2[%c0_9, %c0_10] : memref<1x384xf32, #tpu.memory_space<vmem>>, vector<1x384xf32>
    %c0_11 = arith.constant 0 : index
    %c0_12 = arith.constant 0 : index
    %c109 = arith.constant 109 : index
    %9 = vector.load %arg1[%c0_11, %c0_12, %c109] : memref<1x8x640xf32, #tpu.memory_space<vmem>>, vector<1x8x384xf32>
    %10 = vector.shape_cast %9 : vector<1x8x384xf32> to vector<8x384xf32>
    %c0_13 = arith.constant 0 : index
    %c0_14 = arith.constant 0 : index
    %c110 = arith.constant 110 : index
    %11 = vector.load %arg1[%c0_13, %c0_14, %c110] : memref<1x8x640xf32, #tpu.memory_space<vmem>>, vector<1x8x384xf32>
    %12 = vector.shape_cast %11 : vector<1x8x384xf32> to vector<8x384xf32>
    %c0_15 = arith.constant 0 : index
    %c0_16 = arith.constant 0 : index
    %c111 = arith.constant 111 : index
    %13 = vector.load %arg1[%c0_15, %c0_16, %c111] : memref<1x8x640xf32, #tpu.memory_space<vmem>>, vector<1x8x384xf32>
    %14 = vector.shape_cast %13 : vector<1x8x384xf32> to vector<8x384xf32>
    %c0_17 = arith.constant 0 : index
    %c0_18 = arith.constant 0 : index
    %c127 = arith.constant 127 : index
    %15 = vector.load %arg1[%c0_17, %c0_18, %c127] : memref<1x8x640xf32, #tpu.memory_space<vmem>>, vector<1x8x384xf32>
    %16 = vector.shape_cast %15 : vector<1x8x384xf32> to vector<8x384xf32>
    %c0_19 = arith.constant 0 : index
    %c0_20 = arith.constant 0 : index
    %c128 = arith.constant 128 : index
    %17 = vector.load %arg1[%c0_19, %c0_20, %c128] : memref<1x8x640xf32, #tpu.memory_space<vmem>>, vector<1x8x384xf32>
    %18 = vector.shape_cast %17 : vector<1x8x384xf32> to vector<8x384xf32>
    %c0_21 = arith.constant 0 : index
    %c0_22 = arith.constant 0 : index
    %c129 = arith.constant 129 : index
    %19 = vector.load %arg1[%c0_21, %c0_22, %c129] : memref<1x8x640xf32, #tpu.memory_space<vmem>>, vector<1x8x384xf32>
    %20 = vector.shape_cast %19 : vector<1x8x384xf32> to vector<8x384xf32>
    %c0_23 = arith.constant 0 : index
    %c0_24 = arith.constant 0 : index
    %c145 = arith.constant 145 : index
    %21 = vector.load %arg1[%c0_23, %c0_24, %c145] : memref<1x8x640xf32, #tpu.memory_space<vmem>>, vector<1x8x384xf32>
    %22 = vector.shape_cast %21 : vector<1x8x384xf32> to vector<8x384xf32>
    %c0_25 = arith.constant 0 : index
    %c0_26 = arith.constant 0 : index
    %c146 = arith.constant 146 : index
    %23 = vector.load %arg1[%c0_25, %c0_26, %c146] : memref<1x8x640xf32, #tpu.memory_space<vmem>>, vector<1x8x384xf32>
    %24 = vector.shape_cast %23 : vector<1x8x384xf32> to vector<8x384xf32>
    %c0_27 = arith.constant 0 : index
    %c0_28 = arith.constant 0 : index
    %c147 = arith.constant 147 : index
    %25 = vector.load %arg1[%c0_27, %c0_28, %c147] : memref<1x8x640xf32, #tpu.memory_space<vmem>>, vector<1x8x384xf32>
    %26 = vector.shape_cast %25 : vector<1x8x384xf32> to vector<8x384xf32>
    %27 = tpu.concatenate %10, %12, %14, %16, %18, %20, %22, %24, %26 in 0 : vector<8x384xf32>, vector<8x384xf32>, vector<8x384xf32>, vector<8x384xf32>, vector<8x384xf32>, vector<8x384xf32>, vector<8x384xf32>, vector<8x384xf32>, vector<8x384xf32> -> vector<72x384xf32>
    %c0_29 = arith.constant 0 : index
    %c0_30 = arith.constant 0 : index
    %28 = vector.load %arg3[%c0_29, %c0_30] : memref<8x72xf32, #tpu.memory_space<vmem>>, vector<8x72xf32>
    %cst_31 = arith.constant dense<0.000000e+00> : vector<8x384xf32>
    %29 = tpu.matmul %28, %27, %cst_31 {dimension_numbers = #tpu.dot_dimension_numbers<[1], [0], [0], [1], [0, 0, 1, 1], [], []>} : vector<8x72xf32>, vector<72x384xf32>, vector<8x384xf32> -> vector<8x384xf32>
    %c0_32 = arith.constant 0 : index
    %c0_33 = arith.constant 0 : index
    %30 = vector.load %arg4[%c0_32, %c0_33] : memref<8x1xf32, #tpu.memory_space<vmem>>, vector<8x1xf32>
    %31 = vector.broadcast %30 : vector<8x1xf32> to vector<8x384xf32>
    %32 = arith.addf %29, %31 : vector<8x384xf32>
    %cst_34 = arith.constant 0.000000e+00 : f32
    %33 = vector.broadcast %cst_34 : f32 to vector<8x384xf32>
    %34 = arith.maximumf %32, %33 : vector<8x384xf32>
    %35 = vector.broadcast %8 : vector<1x384xf32> to vector<8x384xf32>
    %36 = arith.mulf %34, %35 : vector<8x384xf32>
    %c0_35 = arith.constant 0 : index
    %c128_36 = arith.constant 128 : index
    %37 = vector.load %arg10[%c0_35, %c128_36] : memref<8x640xf32, #tpu.memory_space<vmem>>, vector<8x384xf32>
    tpu.vector_store %arg10[%c0_35, %c128_36], %36 {strides = array<i32>} : memref<8x640xf32, #tpu.memory_space<vmem>>, vector<8x384xf32>,
    %c0_37 = arith.constant 0 : index
    %c109_38 = arith.constant 109 : index
    %38 = vector.load %arg10[%c0_37, %c109_38] : memref<8x640xf32, #tpu.memory_space<vmem>>, vector<8x384xf32>
    %c0_39 = arith.constant 0 : index
    %c110_40 = arith.constant 110 : index
    %39 = vector.load %arg10[%c0_39, %c110_40] : memref<8x640xf32, #tpu.memory_space<vmem>>, vector<8x384xf32>
    %c0_41 = arith.constant 0 : index
    %c111_42 = arith.constant 111 : index
    %40 = vector.load %arg10[%c0_41, %c111_42] : memref<8x640xf32, #tpu.memory_space<vmem>>, vector<8x384xf32>
    %c0_43 = arith.constant 0 : index
    %c127_44 = arith.constant 127 : index
    %41 = vector.load %arg10[%c0_43, %c127_44] : memref<8x640xf32, #tpu.memory_space<vmem>>, vector<8x384xf32>
    %c0_45 = arith.constant 0 : index
    %c128_46 = arith.constant 128 : index
    %42 = vector.load %arg10[%c0_45, %c128_46] : memref<8x640xf32, #tpu.memory_space<vmem>>, vector<8x384xf32>
    %c0_47 = arith.constant 0 : index
    %c129_48 = arith.constant 129 : index
    %43 = vector.load %arg10[%c0_47, %c129_48] : memref<8x640xf32, #tpu.memory_space<vmem>>, vector<8x384xf32>
    %c0_49 = arith.constant 0 : index
    %c145_50 = arith.constant 145 : index
    %44 = vector.load %arg10[%c0_49, %c145_50] : memref<8x640xf32, #tpu.memory_space<vmem>>, vector<8x384xf32>
    %c0_51 = arith.constant 0 : index
    %c146_52 = arith.constant 146 : index
    %45 = vector.load %arg10[%c0_51, %c146_52] : memref<8x640xf32, #tpu.memory_space<vmem>>, vector<8x384xf32>
    %c0_53 = arith.constant 0 : index
    %c147_54 = arith.constant 147 : index
    %46 = vector.load %arg10[%c0_53, %c147_54] : memref<8x640xf32, #tpu.memory_space<vmem>>, vector<8x384xf32>
    %47 = tpu.concatenate %38, %39, %40, %41, %42, %43, %44, %45, %46 in 0 : vector<8x384xf32>, vector<8x384xf32>, vector<8x384xf32>, vector<8x384xf32>, vector<8x384xf32>, vector<8x384xf32>, vector<8x384xf32>, vector<8x384xf32>, vector<8x384xf32> -> vector<72x384xf32>
    %c0_55 = arith.constant 0 : index
    %c0_56 = arith.constant 0 : index
    %48 = vector.load %arg5[%c0_55, %c0_56] : memref<8x72xf32, #tpu.memory_space<vmem>>, vector<8x72xf32>
    %cst_57 = arith.constant dense<0.000000e+00> : vector<8x384xf32>
    %49 = tpu.matmul %48, %47, %cst_57 {dimension_numbers = #tpu.dot_dimension_numbers<[1], [0], [0], [1], [0, 0, 1, 1], [], []>} : vector<8x72xf32>, vector<72x384xf32>, vector<8x384xf32> -> vector<8x384xf32>
    %c0_58 = arith.constant 0 : index
    %c0_59 = arith.constant 0 : index
    %50 = vector.load %arg6[%c0_58, %c0_59] : memref<8x1xf32, #tpu.memory_space<vmem>>, vector<8x1xf32>
    %51 = vector.broadcast %50 : vector<8x1xf32> to vector<8x384xf32>
    %52 = arith.addf %49, %51 : vector<8x384xf32>
    %cst_60 = arith.constant 0.000000e+00 : f32
    %53 = vector.broadcast %cst_60 : f32 to vector<8x384xf32>
    %54 = arith.maximumf %52, %53 : vector<8x384xf32>
    %55 = vector.broadcast %8 : vector<1x384xf32> to vector<8x384xf32>
    %56 = arith.mulf %54, %55 : vector<8x384xf32>
    %c0_61 = arith.constant 0 : index
    %c128_62 = arith.constant 128 : index
    %57 = vector.load %arg11[%c0_61, %c128_62] : memref<8x640xf32, #tpu.memory_space<vmem>>, vector<8x384xf32>
    tpu.vector_store %arg11[%c0_61, %c128_62], %56 {strides = array<i32>} : memref<8x640xf32, #tpu.memory_space<vmem>>, vector<8x384xf32>,
    %c0_63 = arith.constant 0 : index
    %c109_64 = arith.constant 109 : index
    %58 = vector.load %arg11[%c0_63, %c109_64] : memref<8x640xf32, #tpu.memory_space<vmem>>, vector<8x384xf32>
    %c0_65 = arith.constant 0 : index
    %c110_66 = arith.constant 110 : index
    %59 = vector.load %arg11[%c0_65, %c110_66] : memref<8x640xf32, #tpu.memory_space<vmem>>, vector<8x384xf32>
    %c0_67 = arith.constant 0 : index
    %c111_68 = arith.constant 111 : index
    %60 = vector.load %arg11[%c0_67, %c111_68] : memref<8x640xf32, #tpu.memory_space<vmem>>, vector<8x384xf32>
    %c0_69 = arith.constant 0 : index
    %c127_70 = arith.constant 127 : index
    %61 = vector.load %arg11[%c0_69, %c127_70] : memref<8x640xf32, #tpu.memory_space<vmem>>, vector<8x384xf32>
    %c0_71 = arith.constant 0 : index
    %c128_72 = arith.constant 128 : index
    %62 = vector.load %arg11[%c0_71, %c128_72] : memref<8x640xf32, #tpu.memory_space<vmem>>, vector<8x384xf32>
    %c0_73 = arith.constant 0 : index
    %c129_74 = arith.constant 129 : index
    %63 = vector.load %arg11[%c0_73, %c129_74] : memref<8x640xf32, #tpu.memory_space<vmem>>, vector<8x384xf32>
    %c0_75 = arith.constant 0 : index
    %c145_76 = arith.constant 145 : index
    %64 = vector.load %arg11[%c0_75, %c145_76] : memref<8x640xf32, #tpu.memory_space<vmem>>, vector<8x384xf32>
    %c0_77 = arith.constant 0 : index
    %c146_78 = arith.constant 146 : index
    %65 = vector.load %arg11[%c0_77, %c146_78] : memref<8x640xf32, #tpu.memory_space<vmem>>, vector<8x384xf32>
    %c0_79 = arith.constant 0 : index
    %c147_80 = arith.constant 147 : index
    %66 = vector.load %arg11[%c0_79, %c147_80] : memref<8x640xf32, #tpu.memory_space<vmem>>, vector<8x384xf32>
    %67 = tpu.concatenate %58, %59, %60, %61, %62, %63, %64, %65, %66 in 0 : vector<8x384xf32>, vector<8x384xf32>, vector<8x384xf32>, vector<8x384xf32>, vector<8x384xf32>, vector<8x384xf32>, vector<8x384xf32>, vector<8x384xf32>, vector<8x384xf32> -> vector<72x384xf32>
    %c0_81 = arith.constant 0 : index
    %c0_82 = arith.constant 0 : index
    %68 = vector.load %arg7[%c0_81, %c0_82] : memref<8x72xf32, #tpu.memory_space<vmem>>, vector<8x72xf32>
    %cst_83 = arith.constant dense<0.000000e+00> : vector<8x384xf32>
    %69 = tpu.matmul %68, %67, %cst_83 {dimension_numbers = #tpu.dot_dimension_numbers<[1], [0], [0], [1], [0, 0, 1, 1], [], []>} : vector<8x72xf32>, vector<72x384xf32>, vector<8x384xf32> -> vector<8x384xf32>
    %c0_84 = arith.constant 0 : index
    %c0_85 = arith.constant 0 : index
    %70 = vector.load %arg8[%c0_84, %c0_85] : memref<8x1xf32, #tpu.memory_space<vmem>>, vector<8x1xf32>
    %71 = vector.broadcast %70 : vector<8x1xf32> to vector<8x384xf32>
    %72 = arith.addf %69, %71 : vector<8x384xf32>
    %c0_86 = arith.constant 0 : index
    %c0_87 = arith.constant 0 : index
    %c0_88 = arith.constant 0 : index
    %73 = vector.load %arg9[%c0_86, %c0_87, %c0_88] : memref<1x8x384xf32, #tpu.memory_space<vmem>>, vector<1x8x384xf32>
    %74 = vector.shape_cast %73 : vector<1x8x384xf32> to vector<8x384xf32>
    %75 = vector.shape_cast %72 : vector<8x384xf32> to vector<1x8x384xf32>
    tpu.vector_store %arg9[%c0_86, %c0_87, %c0_88], %75 {strides = array<i32>} : memref<1x8x384xf32, #tpu.memory_space<vmem>>, vector<1x8x384xf32>,
    return
  }
  func.func @transform_0(%arg0: i32) -> (i32, i32, i32) {
    %c0_i32 = arith.constant 0 : i32
    %c0_i32_0 = arith.constant 0 : i32
    %c0_i32_1 = arith.constant 0 : i32
    return %arg0, %c0_i32, %c0_i32_0 : i32, i32, i32
  }
  func.func @transform_1(%arg0: i32) -> (i32, i32) {
    %c0_i32 = arith.constant 0 : i32
    %c0_i32_0 = arith.constant 0 : i32
    %c0_i32_1 = arith.constant 0 : i32
    return %c0_i32, %c0_i32_0 : i32, i32
  }
  func.func @transform_2(%arg0: i32) -> (i32, i32) {
    %c0_i32 = arith.constant 0 : i32
    %c0_i32_0 = arith.constant 0 : i32
    %c0_i32_1 = arith.constant 0 : i32
    return %c0_i32, %c0_i32_0 : i32, i32
  }
  func.func @transform_3(%arg0: i32) -> (i32, i32) {
    %c0_i32 = arith.constant 0 : i32
    %c0_i32_0 = arith.constant 0 : i32
    %c0_i32_1 = arith.constant 0 : i32
    return %c0_i32, %c0_i32_0 : i32, i32
  }
  func.func @transform_4(%arg0: i32) -> (i32, i32) {
    %c0_i32 = arith.constant 0 : i32
    %c0_i32_0 = arith.constant 0 : i32
    %c0_i32_1 = arith.constant 0 : i32
    return %c0_i32, %c0_i32_0 : i32, i32
  }
  func.func @transform_5(%arg0: i32) -> (i32, i32) {
    %c0_i32 = arith.constant 0 : i32
    %c0_i32_0 = arith.constant 0 : i32
    %c0_i32_1 = arith.constant 0 : i32
    return %c0_i32, %c0_i32_0 : i32, i32
  }
  func.func @transform_6(%arg0: i32) -> (i32, i32) {
    %c0_i32 = arith.constant 0 : i32
    %c0_i32_0 = arith.constant 0 : i32
    %c0_i32_1 = arith.constant 0 : i32
    return %c0_i32, %c0_i32_0 : i32, i32
  }
  func.func @transform_7(%arg0: i32) -> (i32, i32) {
    %c0_i32 = arith.constant 0 : i32
    %c0_i32_0 = arith.constant 0 : i32
    %c0_i32_1 = arith.constant 0 : i32
    return %c0_i32, %c0_i32_0 : i32, i32
  }
  func.func @transform_8(%arg0: i32) -> (i32, i32, i32) {
    %c0_i32 = arith.constant 0 : i32
    %c0_i32_0 = arith.constant 0 : i32
    %c0_i32_1 = arith.constant 0 : i32
    return %arg0, %c0_i32, %c0_i32_0 : i32, i32, i32
  }
}

</mosaic_0001>

<bundles_post_ra>
// kernel: _pg_head_forward_level.1
= control target key start
LH: loop header
LB: loop body
LE: loop exit
PB: predicated region body
PF: predicated region fallthrough
CT: control target
= control target key end

     0   :  { %s1744_s27 = smov 0   ;;  %s2334_s0 = inlined_call_operand.vmem [shape: f32[2,8,640], index: 0, kind: input, shape index: {}]   ;;  %s2335_s1 = inlined_call_operand.vmem [shape: f32[1,384], index: 1, kind: input, shape index: {}]   ;;  %s2336_s2 = inlined_call_operand.vmem [shape: f32[8,72], index: 2, kind: input, shape index: {}]   ;;  %s2337_s3 = inlined_call_operand.vmem [shape: f32[8,1], index: 3, kind: input, shape index: {}]   ;;  %s2338_s4 = inlined_call_operand.vmem [shape: f32[8,72], index: 4, kind: input, shape index: {}]   ;;  %s2339_s5 = inlined_call_operand.vmem [shape: f32[8,1], index: 5, kind: input, shape index: {}]   ;;  %s2340_s6 = inlined_call_operand.vmem [shape: f32[8,72], index: 6, kind: input, shape index: {}]   ;;  %s2341_s7 = inlined_call_operand.vmem [shape: f32[8,1], index: 7, kind: input, shape index: {}]   ;;  %s2342_s8 = inlined_call_operand.vmem [shape: f32[2,8,384], index: 8, kind: output, shape index: {}]  }
   0x1 LB: > { %s1547_s28 = sadd.s32 4294967295, %s1685_s27   ;;  %p1551_p0 = scmp.ge.s32.totalorder %s1685_s27, 1  ;;  %s1685_s27 = sphi %s1744_s27, %s18_s27  }
   0x2   : > { %p262_p1 = scmp.lt.s32.totalorder %s1685_s27, 3 }
   0x4   : > { %p263_p2 = pnand %p1551_p0, %p262_p1 }
   0x5   : > { %p296_p3 = scmp.lt.s32.totalorder (!%p263_p2), %s1547_s28, 1  ;;  %s1687_s11 = smov (!%p263_p2), 90  }
   0x6   : > { %266 = sbr.rel (%p263_p2) target bundleno = 1586 (0x632), region = 52  ;;  %s1688_s12 = smov (!%p263_p2), 91  }
   0x7   : > { %s1689_s13 = smov (!%p263_p2), 92   ;;  %s1690_s14 = smov (!%p263_p2), 108  }
   0x8   : > { %s1691_s15 = smov (!%p263_p2), 109   ;;  %s1692_s16 = smov (!%p263_p2), 110  }
   0x9   : > { %s1693_s17 = smov (!%p263_p2), 126   ;;  %s1694_s18 = smov (!%p263_p2), 127  }
   0xa   : > { %s1695_s19 = smov (!%p263_p2), 19  }
   0xb   : > { %s2344_s28 = smov (!%p296_p3, %s1547_s28), 1  ;;  %vm416_vm0 = vcmask 736256   ;;  %vm404_vm1 = vcmask 744448   ;;  %vm392_vm2 = vcmask 752640   ;;  %vm380_vm3 = vcmask 883712   ;;  %v421_v61 = vld [vmem:[%s2337_s3] sm:$0xff] }
   0xc   : > { %s1655_s29 = smul.u32 40, %s2344_s28  ;;  %vm365_vm4 = vcmask 891904   ;;  %v1696_v35 = vmov 0.0   ;;  %vm355_vm5 = vcmask 900096   ;;  %vm343_vm6 = vcmask 1031168  }
   0xd   : > { %1592 = vmatprep.subr.mxu1 %v1696_v35  ;;  %622 = vmatprep.mubr.f32.mxu0 %v1696_v35  ;;  %vm331_vm7 = vcmask 1039360   ;;  %vm1697_vm8 = vmmov 0   ;;  %v1698_v59 = vmov 0   ;;  %vm499_vm9 = vcmask 154624  }
   0xe   : > { %s1758_s10 = scalar_lea.vmem %s2334_s0, %s1655_s29  ;;  %1610 = vmatprep.mubr.msk.f32.mxu1 %vm1697_vm8, %v1696_v35  ;;  %1677 = vset.pattern.permute.xlu1 %v1698_v59  ;;  %vm554_vm10 = vcmask 588800  }
   0xf   : > { %v1761_v0 = vld [vmem:[%s1758_s10 + $0x18] sm:$0xff]  ;;  %v315_v1 = vld [vmem:[%s1758_s10 + $0x8] sm:$0xff]  ;;  %v316_v2 = vld [vmem:[%s1758_s10 + $0x10] sm:$0xff]  ;;  %1678 = vset.pattern.permute.xlu0 %v1698_v59 }
  0x10   : > { %412 = vrot.lane.b32.xlu1 %v1761_v0, %s1687_s11  ;;  %408 = vrot.lane.b32.xlu0 %v315_v1, %s1687_s11  ;;  %v318_v3 = vld [vmem:[%s1758_s10 + $0x20] sm:$0xff] }
  0x11   : > { %v1795_v4 = vld [vmem:[%s1758_s10] sm:$0xff] }
  0x14   : > { %396 = vrot.lane.b32.xlu1 %v315_v1, %s1688_s12  ;;  %410 = vrot.lane.b32.xlu0 %v316_v2, %s1687_s11 }
  0x18   : > { %400 = vrot.lane.b32.xlu1 %v1761_v0, %s1688_s12  ;;  %398 = vrot.lane.b32.xlu0 %v316_v2, %s1688_s12 }
  0x1c   : > { %384 = vrot.lane.b32.xlu1 %v315_v1, %s1689_s13  ;;  %414 = vrot.lane.b32.xlu0 %v318_v3, %s1687_s11 }
  0x20   : > { %388 = vrot.lane.b32.xlu1 %v1761_v0, %s1689_s13  ;;  %386 = vrot.lane.b32.xlu0 %v316_v2, %s1689_s13 }
  0x24   : > { %372 = vrot.lane.b32.xlu1 %v315_v1, %s1690_s14  ;;  %402 = vrot.lane.b32.xlu0 %v318_v3, %s1688_s12 }
  0x28   : > { %376 = vrot.lane.b32.xlu1 %v1761_v0, %s1690_s14  ;;  %374 = vrot.lane.b32.xlu0 %v316_v2, %s1690_s14 }
  0x2c   : > { %390 = vrot.lane.b32.xlu0 %v318_v3, %s1689_s13  ;;  %359 = vrot.lane.b32.xlu1 %v315_v1, %s1691_s15 }
  0x30   : > { %361 = vrot.lane.b32.xlu0 %v316_v2, %s1691_s15  ;;  %363 = vrot.lane.b32.xlu1 %v1761_v0, %s1691_s15 }
  0x34   : > { %378 = vrot.lane.b32.xlu0 %v318_v3, %s1690_s14  ;;  %349 = vrot.lane.b32.xlu1 %v315_v1, %s1692_s16 }
  0x38   : > { %351 = vrot.lane.b32.xlu0 %v316_v2, %s1692_s16  ;;  %353 = vrot.lane.b32.xlu1 %v1761_v0, %s1692_s16 }
  0x3c   : > { %337 = vrot.lane.b32.xlu1 %v315_v1, %s1693_s17  ;;  %347 = vrot.lane.b32.xlu0 %v1795_v4, %s1692_s16 }
  0x40   : > { %341 = vrot.lane.b32.xlu1 %v1761_v0, %s1693_s17  ;;  %339 = vrot.lane.b32.xlu0 %v316_v2, %s1693_s17 }
  0x44   : > { %335 = vrot.lane.b32.xlu0 %v1795_v4, %s1693_s17  ;;  %325 = vrot.lane.b32.xlu1 %v315_v1, %s1694_s18 }
  0x48   : > { %327 = vrot.lane.b32.xlu0 %v316_v2, %s1694_s18  ;;  %329 = vrot.lane.b32.xlu1 %v1761_v0, %s1694_s18 }
  0x4c   : > { %323 = vrot.lane.b32.xlu0 %v1795_v4, %s1694_s18  ;;  %431 = vrot.lane.b32.xlu1 %v316_v2, %s1695_s19 }
  0x50   : > { %429 = vrot.lane.b32.xlu0 %v315_v1, %s1695_s19 }
  0x82   : > { %v1813_v5 = vpop.permute.xlu1 %412  ;;  %v409_v6 = vpop.permute.xlu0 %408 }
  0x83   : > { %491 = vrot.lane.b32.xlu1 %v409_v6, %s1695_s19 }
  0x86   : > { %v397_v7 = vpop.permute.xlu1 %396  ;;  %v411_v8 = vpop.permute.xlu0 %410 }
  0x87   : > { %483 = vrot.lane.b32.xlu0 %v397_v7, %s1695_s19  ;;  %v418_v23 = vsel %vm416_vm0, %v411_v8, %v1813_v5  ;;  %v417_v37 = vsel %vm416_vm0, %v409_v6, %v411_v8 }
  0x8a   : > { %v1817_v9 = vpop.permute.xlu1 %400  ;;  %v399_v10 = vpop.permute.xlu0 %398 }
  0x8b   : > { %v405_v26 = vsel %vm404_vm1, %v397_v7, %v399_v10  ;;  %v406_v39 = vsel %vm404_vm1, %v399_v10, %v1817_v9 }
  0x8e   : > { %v385_v11 = vpop.permute.xlu1 %384  ;;  %v415_v12 = vpop.permute.xlu0 %414 }
  0x8f   : > { %475 = vrot.lane.b32.xlu0 %v385_v11, %s1695_s19  ;;  %v419_v42 = vsel %vm416_vm0, %v1813_v5, %v415_v12 }
  0x92   : > { %v1820_v13 = vpop.permute.xlu1 %388  ;;  %v387_v14 = vpop.permute.xlu0 %386 }
  0x93   : > { %v393_v29 = vsel %vm392_vm2, %v385_v11, %v387_v14  ;;  %v394_v46 = vsel %vm392_vm2, %v387_v14, %v1820_v13 }
  0x96   : > { %v373_v15 = vpop.permute.xlu1 %372  ;;  %v1822_v16 = vpop.permute.xlu0 %402 }
  0x97   : > { %467 = vrot.lane.b32.xlu0 %v373_v15, %s1695_s19  ;;  %v407_v50 = vsel %vm404_vm1, %v1817_v9, %v1822_v16 }
  0x9a   : > { %v1825_v17 = vpop.permute.xlu1 %376  ;;  %v1827_v18 = vpop.permute.xlu0 %374 }
  0x9b   : > { %v381_v31 = vsel %vm380_vm3, %v373_v15, %v1827_v18  ;;  %v382_v52 = vsel %vm380_vm3, %v1827_v18, %v1825_v17 }
  0x9e   : > { %v1829_v19 = vpop.permute.xlu0 %390  ;;  %v360_v20 = vpop.permute.xlu1 %359 }
  0x9f   : > { %459 = vrot.lane.b32.xlu0 %v360_v20, %s1695_s19  ;;  %v395_v53 = vsel %vm392_vm2, %v1820_v13, %v1829_v19 }
  0xa2   : > { %v1832_v21 = vpop.permute.xlu0 %361  ;;  %v1834_v22 = vpop.permute.xlu1 %363 }
  0xa3   : > { %465 = vrot.lane.b32.xlu1 %v1834_v22, %s1695_s19  ;;  %495 = vrot.lane.b32.xlu0 %v418_v23, %s1695_s19  ;;  %v366_v34 = vsel %vm365_vm4, %v360_v20, %v1832_v21  ;;  %v367_v54 = vsel %vm365_vm4, %v1832_v21, %v1834_v22 }
  0xa6   : > { %v379_v24 = vpop.permute.xlu0 %378  ;;  %v350_v25 = vpop.permute.xlu1 %349 }
  0xa7   : > { %485 = vrot.lane.b32.xlu0 %v405_v26, %s1695_s19  ;;  %v383_v55 = vsel %vm380_vm3, %v1825_v17, %v379_v24 }
  0xaa   : > { %v352_v27 = vpop.permute.xlu0 %351  ;;  %v354_v28 = vpop.permute.xlu1 %353 }
  0xab   : > { %457 = vrot.lane.b32.xlu1 %v354_v28, %s1695_s19  ;;  %477 = vrot.lane.b32.xlu0 %v393_v29, %s1695_s19  ;;  %v357_v38 = vsel %vm355_vm5, %v350_v25, %v352_v27  ;;  %v358_v56 = vsel %vm355_vm5, %v352_v27, %v354_v28 }
  0xae   : > { %v338_v30 = vpop.permute.xlu1 %337  ;;  %v348_v32 = vpop.permute.xlu0 %347 }
  0xaf   : > { %469 = vrot.lane.b32.xlu0 %v381_v31, %s1695_s19  ;;  %v356_v40 = vsel %vm355_vm5, %v348_v32, %v350_v25 }
  0xb2   : > { %v342_v33 = vpop.permute.xlu1 %341  ;;  %v340_v36 = vpop.permute.xlu0 %339 }
  0xb3   : > { %449 = vrot.lane.b32.xlu1 %v342_v33, %s1695_s19  ;;  %461 = vrot.lane.b32.xlu0 %v366_v34, %s1695_s19  ;;  %v345_v43 = vsel %vm343_vm6, %v338_v30, %v340_v36  ;;  %v346_v57 = vsel %vm343_vm6, %v340_v36, %v342_v33 }
  0xb6   : > { %v336_v41 = vpop.permute.xlu0 %335  ;;  %v326_v45 = vpop.permute.xlu1 %325 }
  0xb7   : > { %493 = vrot.lane.b32.xlu1 %v417_v37, %s1695_s19  ;;  %453 = vrot.lane.b32.xlu0 %v357_v38, %s1695_s19  ;;  %v344_v47 = vsel %vm343_vm6, %v336_v41, %v338_v30 }
  0xba   : > { %v328_v44 = vpop.permute.xlu0 %327  ;;  %v330_v58 = vpop.permute.xlu1 %329 }
  0xbb   : > { %487 = vrot.lane.b32.xlu1 %v406_v39, %s1695_s19  ;;  %451 = vrot.lane.b32.xlu0 %v356_v40, %s1695_s19  ;;  %v333_v48 = vsel %vm331_vm7, %v326_v45, %v328_v44  ;;  %v334_v60 = vsel %vm331_vm7, %v328_v44, %v330_v58 }
  0xbe   : > { %v324_v49 = vpop.permute.xlu0 %323  ;;  %v1927_v2 = vpop.permute.xlu1 %431 }
  0xbf   : > { %497 = vrot.lane.b32.xlu1 %v419_v42, %s1695_s19  ;;  %445 = vrot.lane.b32.xlu0 %v345_v43, %s1695_s19  ;;  %v332_v51 = vsel %vm331_vm7, %v324_v49, %v326_v45 }
  0xc2   : > { %v1925_v62 = vpop.permute.xlu0 %429 }
  0xc3   : > { %479 = vrot.lane.b32.xlu1 %v394_v46, %s1695_s19  ;;  %443 = vrot.lane.b32.xlu0 %v344_v47, %s1695_s19 }
  0xc7   : > { %489 = vrot.lane.b32.xlu1 %v407_v50, %s1695_s19  ;;  %437 = vrot.lane.b32.xlu0 %v333_v48, %s1695_s19 }
  0xcb   : > { %471 = vrot.lane.b32.xlu1 %v382_v52, %s1695_s19  ;;  %435 = vrot.lane.b32.xlu0 %v332_v51, %s1695_s19 }
  0xcf   : > { %481 = vrot.lane.b32.xlu1 %v395_v53, %s1695_s19  ;;  %427 = vrot.lane.b32.xlu0 %v1795_v4, %s1695_s19 }
  0xd3   : > { %463 = vrot.lane.b32.xlu1 %v367_v54, %s1695_s19  ;;  %433 = vrot.lane.b32.xlu0 %v1761_v0, %s1695_s19 }
  0xd7   : > { %473 = vrot.lane.b32.xlu1 %v383_v55, %s1695_s19  ;;  %820 = vrot.lane.b32.xlu0 %v1696_v35, %s1687_s11 }
  0xdb   : > { %455 = vrot.lane.b32.xlu1 %v358_v56, %s1695_s19  ;;  %809 = vrot.lane.b32.xlu0 %v1696_v35, %s1688_s12  ;;  %v501_v56 = vsel %vm499_vm9, %v1925_v62, %v1927_v2 }
  0xdf   : > { %447 = vrot.lane.b32.xlu1 %v346_v57, %s1695_s19  ;;  %798 = vrot.lane.b32.xlu0 %v1696_v35, %s1689_s13  ;;  %v420_v57 = vld [vmem:[%s2336_s2] sm:$0xff] }
  0xe3   : > { %439 = vrot.lane.b32.xlu1 %v334_v60, %s1695_s19  ;;  %787 = vrot.lane.b32.xlu0 %v1696_v35, %s1690_s14 }
  0xe7   : > { %441 = vrot.lane.b32.xlu1 %v330_v58, %s1695_s19  ;;  %758 = vrot.lane.b32.xlu0 %v1696_v35, %s1692_s16 }
  0xeb   : > { %424 = vperm.xlu1 %1677, %v421_v61   ;;  %747 = vrot.lane.b32.xlu0 %v1696_v35, %s1693_s17 }
  0xf5   : > { %v492_v5 = vpop.permute.xlu1 %491 }
  0xf9   : > { %v484_v63 = vpop.permute.xlu0 %483 }
 0x101   : > { %v476_v0 = vpop.permute.xlu0 %475 }
 0x109   : > { %v468_v1 = vpop.permute.xlu0 %467 }
 0x111   : > { %v460_v3 = vpop.permute.xlu0 %459 }
 0x115   : > { %v496_v4 = vpop.permute.xlu0 %495  ;;  %v466_v7 = vpop.permute.xlu1 %465 }
 0x119   : > { %v486_v6 = vpop.permute.xlu0 %485 }
 0x11a   : > { %v521_v19 = vsel %vm499_vm9, %v484_v63, %v486_v6 }
 0x11d   : > { %v478_v8 = vpop.permute.xlu0 %477  ;;  %v458_v9 = vpop.permute.xlu1 %457 }
 0x11e   : > { %v518_v25 = vsel %vm499_vm9, %v476_v0, %v478_v8 }
 0x121   : > { %v470_v10 = vpop.permute.xlu0 %469 }
 0x122   : > { %v515_v31 = vsel %vm499_vm9, %v468_v1, %v470_v10 }
 0x125   : > { %v1929_v11 = vpop.permute.xlu1 %449  ;;  %v462_v12 = vpop.permute.xlu0 %461 }
 0x126   : > { %v512_v39 = vsel %vm499_vm9, %v460_v3, %v462_v12 }
 0x129   : > { %v494_v13 = vpop.permute.xlu1 %493  ;;  %v454_v18 = vpop.permute.xlu0 %453 }
 0x12a   : > { %v525_v14 = vsel %vm499_vm9, %v494_v13, %v496_v4  ;;  %v524_v15 = vsel %vm499_vm9, %v492_v5, %v494_v13 }
 0x12b   : > { %572 = vmatprep.subr.mxu0 %v525_v14 }
 0x12c   : > { %573 = vmatpush1.msra.mxu0 %v524_v15 }
 0x12d   : > { %v488_v16 = vpop.permute.xlu1 %487  ;;  %v452_v22 = vpop.permute.xlu0 %451 }
 0x12e   : > { %v522_v17 = vsel %vm499_vm9, %v486_v6, %v488_v16  ;;  %v509_v47 = vsel %vm499_vm9, %v452_v22, %v454_v18 }
 0x12f   : > { %574 = vmatprep.subr.mxu0 %v522_v17 }
 0x130   : > { %575 = vmatpush1.msra.mxu0 %v521_v19 }
 0x131   : > { %v498_v20 = vpop.permute.xlu1 %497  ;;  %v446_v28 = vpop.permute.xlu0 %445 }
 0x132   : > { %v526_v21 = vsel %vm499_vm9, %v496_v4, %v498_v20  ;;  %v310_v4 = vld [vmem:[%s2335_s1] sm:$0x7] }
 0x133   : > { %1593 = vmatpush3.msra.mxu1 %v526_v21 }
 0x134   : > { %1594 = vmatprep.subr.mxu1 %v1696_v35 }
 0x135   : > { %v480_v23 = vpop.permute.xlu1 %479  ;;  %v444_v32 = vpop.permute.xlu0 %443 }
 0x136   : > { %v519_v24 = vsel %vm499_vm9, %v478_v8, %v480_v23  ;;  %v506_v52 = vsel %vm499_vm9, %v444_v32, %v446_v28 }
 0x137   : > { %576 = vmatprep.subr.mxu0 %v519_v24 }
 0x138   : > { %577 = vmatpush1.msra.mxu0 %v518_v25 }
 0x139   : > { %v490_v26 = vpop.permute.xlu1 %489  ;;  %v438_v38 = vpop.permute.xlu0 %437 }
 0x13a   : > { %v523_v27 = vsel %vm499_vm9, %v488_v16, %v490_v26 }
 0x13b   : > { %1595 = vmatpush3.msra.mxu1 %v523_v27 }
 0x13c   : > { %1596 = vmatprep.subr.mxu1 %v1696_v35 }
 0x13d   : > { %v472_v29 = vpop.permute.xlu1 %471  ;;  %v436_v43 = vpop.permute.xlu0 %435 }
 0x13e   : > { %v516_v30 = vsel %vm499_vm9, %v470_v10, %v472_v29  ;;  %v503_v55 = vsel %vm499_vm9, %v436_v43, %v438_v38 }
 0x13f   : > { %578 = vmatprep.subr.mxu0 %v516_v30 }
 0x140   : > { %579 = vmatpush1.msra.mxu0 %v515_v31 }
 0x141   : > { %v482_v33 = vpop.permute.xlu1 %481  ;;  %v428_v51 = vpop.permute.xlu0 %427 }
 0x142   : > { %v520_v34 = vsel %vm499_vm9, %v480_v23, %v482_v33  ;;  %v500_v60 = vsel %vm499_vm9, %v428_v51, %v1925_v62  ;;  %v703_v62 = vlaneseq }
 0x143   : > { %1597 = vmatpush3.msra.mxu1 %v520_v34 }
 0x144   : > { %1598 = vmatprep.subr.mxu1 %v1696_v35  ;;  %v704_v0 = vshrl.u32 %v703_v62, 7 }
 0x145   : > { %v464_v36 = vpop.permute.xlu1 %463  ;;  %v434_v58 = vpop.permute.xlu0 %433 }
 0x146   : > { %v513_v37 = vsel %vm499_vm9, %v462_v12, %v464_v36  ;;  %v514_v42 = vsel %vm499_vm9, %v464_v36, %v466_v7  ;;  %v502_v63 = vsel %vm499_vm9, %v1927_v2, %v434_v58  ;;  %v713_v1 = vsub.s32 2, %v704_v0 }
 0x147   : > { %580 = vmatprep.subr.mxu0 %v513_v37  ;;  %v705_v7 = vsub.s32 0, %v704_v0 }
 0x148   : > { %581 = vmatpush1.msra.mxu0 %v512_v39 }
 0x149   : > { %v474_v40 = vpop.permute.xlu1 %473  ;;  %v1985_v13 = vrot.slane %v310_v4, %v705_v7  ;;  %v821_v22 = vpop.permute.xlu0 %820 }
 0x14a   : > { %v517_v41 = vsel %vm499_vm9, %v472_v29, %v474_v40 }
 0x14b   : > { %1599 = vmatpush3.msra.mxu1 %v517_v41 }
 0x14c   : > { %1600 = vmatprep.subr.mxu1 %v1696_v35 }
 0x14d   : > { %v456_v44 = vpop.permute.xlu1 %455  ;;  %1601 = vmatpush3.msra.mxu1 %v514_v42  ;;  %v810_v23 = vpop.permute.xlu0 %809 }
 0x14e   : > { %1602 = vmatprep.subr.mxu1 %v1696_v35  ;;  %v510_v45 = vsel %vm499_vm9, %v454_v18, %v456_v44  ;;  %v511_v46 = vsel %vm499_vm9, %v456_v44, %v458_v9  ;;  %v1983_v9 = vrot.slane %v310_v4, %v713_v1  ;;  %v709_v18 = vsub.s32 1, %v704_v0 }
 0x14f   : > { %582 = vmatprep.subr.mxu0 %v510_v45  ;;  %1603 = vmatpush3.msra.mxu1 %v511_v46 }
 0x150   : > { %583 = vmatpush1.msra.mxu0 %v509_v47  ;;  %1604 = vmatprep.subr.mxu1 %v1696_v35  ;;  %v2002_v20 = vrot.slane %v310_v4, %v709_v18 }
 0x151   : > { %v448_v48 = vpop.permute.xlu1 %447  ;;  %v799_v24 = vpop.permute.xlu0 %798 }
 0x152   : > { %v507_v49 = vsel %vm499_vm9, %v446_v28, %v448_v48  ;;  %v508_v50 = vsel %vm499_vm9, %v448_v48, %v1929_v11 }
 0x153   : > { %584 = vmatprep.subr.mxu0 %v507_v49  ;;  %1605 = vmatpush3.msra.mxu1 %v508_v50 }
 0x154   : > { %585 = vmatpush1.msra.mxu0 %v506_v52  ;;  %1606 = vmatprep.subr.mxu1 %v1696_v35 }
 0x155   : > { %v440_v53 = vpop.permute.xlu1 %439  ;;  %v788_v25 = vpop.permute.xlu0 %787 }
 0x156   : > { %v504_v54 = vsel %vm499_vm9, %v438_v38, %v440_v53 }
 0x157   : > { %586 = vmatprep.subr.mxu0 %v504_v54 }
 0x158   : > { %587 = vmatpush1.msra.mxu0 %v503_v55 }
 0x159   : > { %v442_v59 = vpop.permute.xlu1 %441  ;;  %588 = vmatprep.subr.mxu0 %v501_v56  ;;  %v759_v28 = vpop.permute.xlu0 %758 }
 0x15a   : > { %589 = vmatpush1.msra.mxu0 %v500_v60  ;;  %v505_v61 = vsel %vm499_vm9, %v440_v53, %v442_v59 }
 0x15b   : > { %1607 = vmatpush3.msra.mxu1 %v505_v61  ;;  %1554 = vmatmul.mubr.msk.f32.vlgmr.msra.gmra.mxu0 %vm554_vm10, %v420_v57 }
 0x15c   : > { %1608 = vmatprep.subr.mxu1 %v1696_v35  ;;  %1025 = vmatprep.mubr.f32.mxu0 %v1696_v35 }
 0x15d   : > { %1609 = vmatpush3.msra.mxu1 %v502_v63  ;;  %v748_v30 = vpop.permute.xlu0 %747 }
 0x15e   : > { %1611 = vmatmul.mubr.msk.f32.vlgmr.msra.gmra.mxu1 %vm554_vm10, %v420_v57  ;;  %1613 = vmatprep.subr.mxu1 %v1696_v35 }
 0x15f   : > { %1631 = vmatprep.mubr.msk.f32.mxu1 %vm1697_vm8, %v1696_v35 }
 0x166   : > { %v425_v3 = vpop.permute.xlu1 %424 }
 0x21b   : > { %v624_v5 = vpop.f32.mrf.mxu0 }
 0x21c   : > { %v625_v6 = vadd.f32 %v624_v5, %v425_v3 }
 0x21d   : > { %v626_v16 = vpop.f32.mrf.mxu0 }
 0x21e   : > { %v695_v2 = vpop.f32.mrf.mxu1  ;;  %v699_v12 = vmax.f32 %v625_v6, 0.0  ;;  %v627_v17 = vadd.f32 %v626_v16, %v425_v3 }
 0x21f   : > { %v696_v8 = vadd.f32 %v695_v2, %v425_v3 }
 0x220   : > { %v1612_v10 = vpop.f32.mrf.mxu1  ;;  %v718_v15 = vmul.f32 %v1985_v13, %v699_v12  ;;  %v700_v19 = vmax.f32 %v627_v17, 0.0  ;;  %v826_v17 = vld [vmem:[%s2339_s5] sm:$0xff] }
 0x221   : > { %v701_v11 = vmax.f32 %v696_v8, 0.0 }
 0x222   : > { %v719_v21 = vmul.f32 %v2002_v20, %v700_v19 }
 0x223   : > { %v1988_v14 = vmul.f32 %v1983_v9, %v701_v11 }
 0x225   : > { %807 = vrot.lane.b32.xlu1 %v1988_v14, %s1688_s12  ;;  %818 = vrot.lane.b32.xlu0 %v1988_v14, %s1687_s11 }
 0x229   : > { %796 = vrot.lane.b32.xlu1 %v1988_v14, %s1689_s13  ;;  %814 = vrot.lane.b32.xlu0 %v718_v15, %s1687_s11 }
 0x22d   : > { %785 = vrot.lane.b32.xlu1 %v1988_v14, %s1690_s14  ;;  %736 = vrot.lane.b32.xlu0 %v1696_v35, %s1694_s18 }
 0x231   : > { %773 = vrot.lane.b32.xlu1 %v1988_v14, %s1691_s15  ;;  %834 = vrot.lane.b32.xlu0 %v718_v15, %s1695_s19 }
 0x235   : > { %764 = vrot.lane.b32.xlu1 %v1988_v14, %s1692_s16  ;;  %805 = vrot.lane.b32.xlu0 %v719_v21, %s1688_s12 }
 0x239   : > { %753 = vrot.lane.b32.xlu1 %v1988_v14, %s1693_s17  ;;  %794 = vrot.lane.b32.xlu0 %v719_v21, %s1689_s13 }
 0x23d   : > { %803 = vrot.lane.b32.xlu1 %v718_v15, %s1688_s12  ;;  %783 = vrot.lane.b32.xlu0 %v719_v21, %s1690_s14 }
 0x241   : > { %792 = vrot.lane.b32.xlu1 %v718_v15, %s1689_s13  ;;  %771 = vrot.lane.b32.xlu0 %v719_v21, %s1691_s15 }
 0x245   : > { %781 = vrot.lane.b32.xlu1 %v718_v15, %s1690_s14  ;;  %762 = vrot.lane.b32.xlu0 %v719_v21, %s1692_s16 }
 0x249   : > { %769 = vrot.lane.b32.xlu1 %v718_v15, %s1691_s15  ;;  %751 = vrot.lane.b32.xlu0 %v719_v21, %s1693_s17 }
 0x24d   : > { %760 = vrot.lane.b32.xlu1 %v718_v15, %s1692_s16  ;;  %740 = vrot.lane.b32.xlu0 %v719_v21, %s1694_s18 }
 0x251   : > { %749 = vrot.lane.b32.xlu1 %v718_v15, %s1693_s17 }
 0x255   : > { %738 = vrot.lane.b32.xlu1 %v718_v15, %s1694_s18 }
 0x259   : > { %816 = vrot.lane.b32.xlu1 %v719_v21, %s1687_s11 }
 0x25d   : > { %742 = vrot.lane.b32.xlu1 %v1988_v14, %s1694_s18 }
 0x261   : > { %836 = vrot.lane.b32.xlu1 %v719_v21, %s1695_s19 }
 0x297   : > { %v808_v26 = vpop.permute.xlu1 %807  ;;  %v819_v33 = vpop.permute.xlu0 %818 }
 0x298   : > { %v824_v39 = vsel %vm416_vm0, %v819_v33, %v821_v22  ;;  %v813_v42 = vsel %vm404_vm1, %v808_v26, %v810_v23 }
 0x29b   : > { %v797_v27 = vpop.permute.xlu1 %796  ;;  %v815_v36 = vpop.permute.xlu0 %814 }
 0x29c   : > { %v802_v44 = vsel %vm392_vm2, %v797_v27, %v799_v24 }
 0x29f   : > { %v786_v29 = vpop.permute.xlu1 %785  ;;  %v737_v40 = vpop.permute.xlu0 %736 }
 0x2a0   : > { %v791_v47 = vsel %vm380_vm3, %v786_v29, %v788_v25 }
 0x2a3   : > { %v774_v31 = vpop.permute.xlu1 %773  ;;  %v2047_v45 = vpop.permute.xlu0 %834 }
 0x2a4   : > { %870 = vrot.lane.b32.xlu1 %v774_v31, %s1695_s19 }
 0x2a7   : > { %v765_v32 = vpop.permute.xlu1 %764  ;;  %v806_v49 = vpop.permute.xlu0 %805 }
 0x2a8   : > { %862 = vrot.lane.b32.xlu1 %v765_v32, %s1695_s19  ;;  %v812_v59 = vsel %vm404_vm1, %v806_v49, %v808_v26 }
 0x2ab   : > { %v2032_v34 = vpop.permute.xlu1 %753  ;;  %v795_v54 = vpop.permute.xlu0 %794 }
 0x2ac   : > { %854 = vrot.lane.b32.xlu1 %v2032_v34, %s1695_s19  ;;  %v801_v61 = vsel %vm392_vm2, %v795_v54, %v797_v27 }
 0x2af   : > { %v804_v37 = vpop.permute.xlu1 %803  ;;  %v784_v58 = vpop.permute.xlu0 %783 }
 0x2b0   : > { %888 = vrot.lane.b32.xlu0 %v804_v37, %s1695_s19  ;;  %896 = vrot.lane.b32.xlu1 %v815_v36, %s1695_s19  ;;  %v811_v60 = vsel %vm404_vm1, %v804_v37, %v806_v49  ;;  %v790_v0 = vsel %vm380_vm3, %v784_v58, %v786_v29 }
 0x2b3   : > { %v793_v38 = vpop.permute.xlu1 %792  ;;  %v772_v62 = vpop.permute.xlu0 %771 }
 0x2b4   : > { %880 = vrot.lane.b32.xlu0 %v793_v38, %s1695_s19  ;;  %902 = vrot.lane.b32.xlu1 %v824_v39, %s1695_s19  ;;  %v800_v63 = vsel %vm392_vm2, %v793_v38, %v795_v54  ;;  %v776_v4 = vsel %vm365_vm4, %v772_v62, %v774_v31 }
 0x2b7   : > { %v782_v41 = vpop.permute.xlu1 %781  ;;  %v763_v3 = vpop.permute.xlu0 %762 }
 0x2b8   : > { %872 = vrot.lane.b32.xlu0 %v782_v41, %s1695_s19  ;;  %894 = vrot.lane.b32.xlu1 %v813_v42, %s1695_s19  ;;  %v789_v1 = vsel %vm380_vm3, %v782_v41, %v784_v58  ;;  %v768_v2 = vsel %vm355_vm5, %v763_v3, %v765_v32 }
 0x2bb   : > { %v770_v43 = vpop.permute.xlu1 %769  ;;  %v752_v7 = vpop.permute.xlu0 %751 }
 0x2bc   : > { %864 = vrot.lane.b32.xlu0 %v770_v43, %s1695_s19  ;;  %886 = vrot.lane.b32.xlu1 %v802_v44, %s1695_s19  ;;  %v775_v5 = vsel %vm365_vm4, %v770_v43, %v772_v62  ;;  %v757_v8 = vsel %vm343_vm6, %v752_v7, %v2032_v34 }
 0x2bf   : > { %v761_v46 = vpop.permute.xlu1 %760  ;;  %v741_v12 = vpop.permute.xlu0 %740 }
 0x2c0   : > { %878 = vrot.lane.b32.xlu1 %v791_v47, %s1695_s19  ;;  %v766_v48 = vsel %vm355_vm5, %v759_v28, %v761_v46  ;;  %v767_v6 = vsel %vm355_vm5, %v761_v46, %v763_v3 }
 0x2c1   : > { %856 = vrot.lane.b32.xlu0 %v766_v48, %s1695_s19 }
 0x2c3   : > { %v750_v50 = vpop.permute.xlu1 %749 }
 0x2c4   : > { %v755_v51 = vsel %vm343_vm6, %v748_v30, %v750_v50  ;;  %v756_v10 = vsel %vm343_vm6, %v750_v50, %v752_v7 }
 0x2c5   : > { %848 = vrot.lane.b32.xlu0 %v755_v51, %s1695_s19 }
 0x2c7   : > { %v739_v52 = vpop.permute.xlu1 %738 }
 0x2c8   : > { %v744_v53 = vsel %vm331_vm7, %v737_v40, %v739_v52  ;;  %v745_v16 = vsel %vm331_vm7, %v739_v52, %v741_v12 }
 0x2c9   : > { %840 = vrot.lane.b32.xlu0 %v744_v53, %s1695_s19 }
 0x2cb   : > { %v817_v55 = vpop.permute.xlu1 %816 }
 0x2cc   : > { %v822_v56 = vsel %vm416_vm0, %v815_v36, %v817_v55  ;;  %v823_v57 = vsel %vm416_vm0, %v817_v55, %v819_v33 }
 0x2cd   : > { %898 = vrot.lane.b32.xlu1 %v822_v56, %s1695_s19  ;;  %900 = vrot.lane.b32.xlu0 %v823_v57, %s1695_s19 }
 0x2cf   : > { %v743_v11 = vpop.permute.xlu1 %742 }
 0x2d0   : > { %v746_v15 = vsel %vm331_vm7, %v741_v12, %v743_v11 }
 0x2d1   : > { %892 = vrot.lane.b32.xlu1 %v812_v59, %s1695_s19  ;;  %890 = vrot.lane.b32.xlu0 %v811_v60, %s1695_s19 }
 0x2d3   : > { %v2110_v18 = vpop.permute.xlu1 %836 }
 0x2d4   : > { %v905_v12 = vsel %vm499_vm9, %v2047_v45, %v2110_v18 }
 0x2d5   : > { %884 = vrot.lane.b32.xlu1 %v801_v61, %s1695_s19  ;;  %882 = vrot.lane.b32.xlu0 %v800_v63, %s1695_s19 }
 0x2d9   : > { %876 = vrot.lane.b32.xlu1 %v790_v0, %s1695_s19  ;;  %874 = vrot.lane.b32.xlu0 %v789_v1, %s1695_s19 }
 0x2dd   : > { %868 = vrot.lane.b32.xlu1 %v776_v4, %s1695_s19  ;;  %866 = vrot.lane.b32.xlu0 %v775_v5, %s1695_s19 }
 0x2e1   : > { %860 = vrot.lane.b32.xlu1 %v768_v2, %s1695_s19  ;;  %858 = vrot.lane.b32.xlu0 %v767_v6, %s1695_s19 }
 0x2e5   : > { %852 = vrot.lane.b32.xlu1 %v757_v8, %s1695_s19  ;;  %850 = vrot.lane.b32.xlu0 %v756_v10, %s1695_s19 }
 0x2e9   : > { %844 = vrot.lane.b32.xlu1 %v746_v15, %s1695_s19  ;;  %842 = vrot.lane.b32.xlu0 %v745_v16, %s1695_s19 }
 0x2ed   : > { %846 = vrot.lane.b32.xlu1 %v743_v11, %s1695_s19  ;;  %832 = vrot.lane.b32.xlu0 %v1696_v35, %s1695_s19 }
 0x2f1   : > { %829 = vperm.xlu1 %1677, %v826_v17   ;;  %838 = vrot.lane.b32.xlu0 %v1988_v14, %s1695_s19  ;;  %v825_v17 = vld [vmem:[%s2338_s4] sm:$0xff] }
 0x2f5   : > { %1207 = vrot.lane.b32.xlu0 %v1696_v35, %s1687_s11 }
 0x2f9   : > { %1196 = vrot.lane.b32.xlu0 %v1696_v35, %s1688_s12 }
 0x2fd   : > { %1185 = vrot.lane.b32.xlu0 %v1696_v35, %s1689_s13 }
 0x301   : > { %1174 = vrot.lane.b32.xlu0 %v1696_v35, %s1690_s14 }
 0x305   : > { %1145 = vrot.lane.b32.xlu0 %v1696_v35, %s1692_s16 }
 0x309   : > { %1134 = vrot.lane.b32.xlu0 %v1696_v35, %s1693_s17 }
 0x316   : > { %v871_v14 = vpop.permute.xlu1 %870 }
 0x31a   : > { %v863_v19 = vpop.permute.xlu1 %862 }
 0x31e   : > { %v2112_v21 = vpop.permute.xlu1 %854 }
 0x322   : > { %v889_v22 = vpop.permute.xlu0 %888  ;;  %v897_v23 = vpop.permute.xlu1 %896 }
 0x326   : > { %v881_v24 = vpop.permute.xlu0 %880  ;;  %v903_v25 = vpop.permute.xlu1 %902 }
 0x32a   : > { %v873_v26 = vpop.permute.xlu0 %872  ;;  %v895_v28 = vpop.permute.xlu1 %894 }
 0x32e   : > { %v865_v27 = vpop.permute.xlu0 %864  ;;  %v887_v30 = vpop.permute.xlu1 %886 }
 0x332   : > { %v879_v32 = vpop.permute.xlu1 %878 }
 0x333   : > { %v857_v29 = vpop.permute.xlu0 %856 }
 0x337   : > { %v849_v31 = vpop.permute.xlu0 %848 }
 0x33b   : > { %v2114_v33 = vpop.permute.xlu0 %840 }
 0x33f   : > { %v899_v34 = vpop.permute.xlu1 %898  ;;  %v901_v36 = vpop.permute.xlu0 %900 }
 0x340   : > { %v928_v37 = vsel %vm499_vm9, %v897_v23, %v899_v34  ;;  %v930_v38 = vsel %vm499_vm9, %v901_v36, %v903_v25  ;;  %v929_v39 = vsel %vm499_vm9, %v899_v34, %v901_v36 }
 0x341   : > { %975 = vmatprep.subr.mxu0 %v929_v39  ;;  %1614 = vmatpush3.msra.mxu1 %v930_v38 }
 0x342   : > { %976 = vmatpush1.msra.mxu0 %v928_v37  ;;  %1615 = vmatprep.subr.mxu1 %v1696_v35 }
 0x343   : > { %v893_v40 = vpop.permute.xlu1 %892  ;;  %v891_v41 = vpop.permute.xlu0 %890 }
 0x344   : > { %v927_v42 = vsel %vm499_vm9, %v893_v40, %v895_v28  ;;  %v925_v43 = vsel %vm499_vm9, %v889_v22, %v891_v41  ;;  %v926_v44 = vsel %vm499_vm9, %v891_v41, %v893_v40 }
 0x345   : > { %977 = vmatprep.subr.mxu0 %v926_v44  ;;  %1616 = vmatpush3.msra.mxu1 %v927_v42 }
 0x346   : > { %978 = vmatpush1.msra.mxu0 %v925_v43  ;;  %1617 = vmatprep.subr.mxu1 %v1696_v35 }
 0x347   : > { %v885_v46 = vpop.permute.xlu1 %884  ;;  %v883_v47 = vpop.permute.xlu0 %882 }
 0x348   : > { %v924_v48 = vsel %vm499_vm9, %v885_v46, %v887_v30  ;;  %v922_v49 = vsel %vm499_vm9, %v881_v24, %v883_v47  ;;  %v923_v50 = vsel %vm499_vm9, %v883_v47, %v885_v46 }
 0x349   : > { %979 = vmatprep.subr.mxu0 %v923_v50  ;;  %1618 = vmatpush3.msra.mxu1 %v924_v48 }
 0x34a   : > { %980 = vmatpush1.msra.mxu0 %v922_v49  ;;  %1619 = vmatprep.subr.mxu1 %v1696_v35 }
 0x34b   : > { %v877_v51 = vpop.permute.xlu1 %876  ;;  %v875_v52 = vpop.permute.xlu0 %874 }
 0x34c   : > { %v921_v53 = vsel %vm499_vm9, %v877_v51, %v879_v32  ;;  %v919_v54 = vsel %vm499_vm9, %v873_v26, %v875_v52  ;;  %v920_v55 = vsel %vm499_vm9, %v875_v52, %v877_v51 }
 0x34d   : > { %981 = vmatprep.subr.mxu0 %v920_v55  ;;  %1620 = vmatpush3.msra.mxu1 %v921_v53 }
 0x34e   : > { %982 = vmatpush1.msra.mxu0 %v919_v54  ;;  %1621 = vmatprep.subr.mxu1 %v1696_v35 }
 0x34f   : > { %v869_v56 = vpop.permute.xlu1 %868  ;;  %v867_v57 = vpop.permute.xlu0 %866 }
 0x350   : > { %v918_v58 = vsel %vm499_vm9, %v869_v56, %v871_v14  ;;  %v916_v59 = vsel %vm499_vm9, %v865_v27, %v867_v57  ;;  %v917_v60 = vsel %vm499_vm9, %v867_v57, %v869_v56 }
 0x351   : > { %983 = vmatprep.subr.mxu0 %v917_v60  ;;  %1622 = vmatpush3.msra.mxu1 %v918_v58 }
 0x352   : > { %984 = vmatpush1.msra.mxu0 %v916_v59  ;;  %1623 = vmatprep.subr.mxu1 %v1696_v35 }
 0x353   : > { %v861_v61 = vpop.permute.xlu1 %860  ;;  %v859_v63 = vpop.permute.xlu0 %858 }
 0x354   : > { %v915_v62 = vsel %vm499_vm9, %v861_v61, %v863_v19  ;;  %v913_v0 = vsel %vm499_vm9, %v857_v29, %v859_v63  ;;  %v914_v1 = vsel %vm499_vm9, %v859_v63, %v861_v61 }
 0x355   : > { %985 = vmatprep.subr.mxu0 %v914_v1  ;;  %1624 = vmatpush3.msra.mxu1 %v915_v62 }
 0x356   : > { %986 = vmatpush1.msra.mxu0 %v913_v0  ;;  %1625 = vmatprep.subr.mxu1 %v1696_v35 }
 0x357   : > { %v853_v3 = vpop.permute.xlu1 %852  ;;  %v851_v4 = vpop.permute.xlu0 %850 }
 0x358   : > { %v912_v5 = vsel %vm499_vm9, %v853_v3, %v2112_v21  ;;  %v910_v2 = vsel %vm499_vm9, %v849_v31, %v851_v4  ;;  %v911_v6 = vsel %vm499_vm9, %v851_v4, %v853_v3 }
 0x359   : > { %987 = vmatprep.subr.mxu0 %v911_v6  ;;  %1626 = vmatpush3.msra.mxu1 %v912_v5 }
 0x35a   : > { %988 = vmatpush1.msra.mxu0 %v910_v2  ;;  %1627 = vmatprep.subr.mxu1 %v1696_v35 }
 0x35b   : > { %v845_v7 = vpop.permute.xlu1 %844  ;;  %v843_v8 = vpop.permute.xlu0 %842 }
 0x35c   : > { %v907_v10 = vsel %vm499_vm9, %v2114_v33, %v843_v8  ;;  %v908_v11 = vsel %vm499_vm9, %v843_v8, %v845_v7 }
 0x35d   : > { %989 = vmatprep.subr.mxu0 %v908_v11 }
 0x35e   : > { %990 = vmatpush1.msra.mxu0 %v907_v10 }
 0x35f   : > { %v847_v15 = vpop.permute.xlu1 %846  ;;  %991 = vmatprep.subr.mxu0 %v905_v12  ;;  %v833_v16 = vpop.permute.xlu0 %832 }
 0x360   : > { %v909_v14 = vsel %vm499_vm9, %v845_v7, %v847_v15  ;;  %v904_v19 = vsel %vm499_vm9, %v833_v16, %v2047_v45 }
 0x361   : > { %992 = vmatpush1.msra.mxu0 %v904_v19  ;;  %1628 = vmatpush3.msra.mxu1 %v909_v14 }
 0x362   : > { %1556 = vmatmul.mubr.msk.f32.vlgmr.msra.gmra.mxu0 %vm554_vm10, %v825_v17  ;;  %1629 = vmatprep.subr.mxu1 %v1696_v35 }
 0x363   : > { %v839_v21 = vpop.permute.xlu0 %838  ;;  %1412 = vmatprep.mubr.f32.mxu0 %v1696_v35 }
 0x364   : > { %v906_v22 = vsel %vm499_vm9, %v2110_v18, %v839_v21 }
 0x365   : > { %1630 = vmatpush3.msra.mxu1 %v906_v22 }
 0x366   : > { %1632 = vmatmul.mubr.msk.f32.vlgmr.msra.gmra.mxu1 %vm554_vm10, %v825_v17  ;;  %1634 = vmatprep.subr.mxu1 %v1696_v35 }
 0x367   : > { %1652 = vmatprep.mubr.msk.f32.mxu1 %vm1697_vm8, %v1696_v35 }
 0x36c   : > { %v830_v23 = vpop.permute.xlu1 %829 }
 0x422   : > { %v1027_v45 = vpop.f32.mrf.mxu0 }
 0x423   : > { %v1028_v25 = vadd.f32 %v1027_v45, %v830_v23 }
 0x424   : > { %v1029_v31 = vpop.f32.mrf.mxu0 }
 0x425   : > { %v1102_v29 = vmax.f32 %v1028_v25, 0.0  ;;  %v1030_v32 = vadd.f32 %v1029_v31, %v830_v23 }
 0x426   : > { %v1098_v24 = vpop.f32.mrf.mxu1 }
 0x427   : > { %v1099_v26 = vadd.f32 %v1098_v24, %v830_v23  ;;  %v1105_v18 = vmul.f32 %v1102_v29, %v1985_v13 }
 0x428   : > { %v1633_v27 = vpop.f32.mrf.mxu1 }
 0x429   : > { %v1104_v28 = vmax.f32 %v1099_v26, 0.0 }
 0x42b   : > { %v2167_v30 = vmul.f32 %v1104_v28, %v1983_v9  ;;  %v1103_v9 = vmax.f32 %v1030_v32, 0.0  ;;  %v1213_v28 = vld [vmem:[%s2341_s7] sm:$0xff] }
 0x42d   : > { %1194 = vrot.lane.b32.xlu1 %v2167_v30, %s1688_s12  ;;  %1205 = vrot.lane.b32.xlu0 %v2167_v30, %s1687_s11  ;;  %v1106_v13 = vmul.f32 %v1103_v9, %v2002_v20  ;;  %v1208_v20 = vpop.permute.xlu0 %1207 }
 0x431   : > { %1183 = vrot.lane.b32.xlu1 %v2167_v30, %s1689_s13  ;;  %1201 = vrot.lane.b32.xlu0 %v1105_v18, %s1687_s11  ;;  %v1197_v33 = vpop.permute.xlu0 %1196 }
 0x435   : > { %1172 = vrot.lane.b32.xlu1 %v2167_v30, %s1690_s14  ;;  %1123 = vrot.lane.b32.xlu0 %v1696_v35, %s1694_s18  ;;  %v1186_v34 = vpop.permute.xlu0 %1185 }
 0x439   : > { %1160 = vrot.lane.b32.xlu1 %v2167_v30, %s1691_s15  ;;  %1221 = vrot.lane.b32.xlu0 %v1105_v18, %s1695_s19  ;;  %v1175_v36 = vpop.permute.xlu0 %1174 }
 0x43d   : > { %1151 = vrot.lane.b32.xlu1 %v2167_v30, %s1692_s16  ;;  %1192 = vrot.lane.b32.xlu0 %v1106_v13, %s1688_s12  ;;  %v1146_v39 = vpop.permute.xlu0 %1145 }
 0x441   : > { %1140 = vrot.lane.b32.xlu1 %v2167_v30, %s1693_s17  ;;  %1181 = vrot.lane.b32.xlu0 %v1106_v13, %s1689_s13  ;;  %v1135_v41 = vpop.permute.xlu0 %1134 }
 0x445   : > { %1190 = vrot.lane.b32.xlu1 %v1105_v18, %s1688_s12  ;;  %1170 = vrot.lane.b32.xlu0 %v1106_v13, %s1690_s14 }
 0x449   : > { %1179 = vrot.lane.b32.xlu1 %v1105_v18, %s1689_s13  ;;  %1158 = vrot.lane.b32.xlu0 %v1106_v13, %s1691_s15 }
 0x44d   : > { %1168 = vrot.lane.b32.xlu1 %v1105_v18, %s1690_s14  ;;  %1149 = vrot.lane.b32.xlu0 %v1106_v13, %s1692_s16  ;;  %s1656_s14 = smul.u32 24, %s2344_s28 }
 0x451   : > { %1156 = vrot.lane.b32.xlu1 %v1105_v18, %s1691_s15  ;;  %1138 = vrot.lane.b32.xlu0 %v1106_v13, %s1693_s17 }
 0x455   : > { %1147 = vrot.lane.b32.xlu1 %v1105_v18, %s1692_s16  ;;  %1127 = vrot.lane.b32.xlu0 %v1106_v13, %s1694_s18 }
 0x459   : > { %1136 = vrot.lane.b32.xlu1 %v1105_v18, %s1693_s17  ;;  %s305_s17 = scalar_lea.vmem %s2342_s8, %s1656_s14 }
 0x45d   : > { %1125 = vrot.lane.b32.xlu1 %v1105_v18, %s1694_s18 }
 0x461   : > { %1203 = vrot.lane.b32.xlu1 %v1106_v13, %s1687_s11 }
 0x465   : > { %1129 = vrot.lane.b32.xlu1 %v2167_v30, %s1694_s18 }
 0x469   : > { %1223 = vrot.lane.b32.xlu1 %v1106_v13, %s1695_s19 }
 0x49f   : > { %v1195_v37 = vpop.permute.xlu1 %1194  ;;  %v1206_v44 = vpop.permute.xlu0 %1205 }
 0x4a0   : > { %v1211_v49 = vsel %vm416_vm0, %v1206_v44, %v1208_v20  ;;  %v1200_v51 = vsel %vm404_vm1, %v1195_v37, %v1197_v33 }
 0x4a3   : > { %v1184_v38 = vpop.permute.xlu1 %1183  ;;  %v1202_v47 = vpop.permute.xlu0 %1201 }
 0x4a4   : > { %v1189_v54 = vsel %vm392_vm2, %v1184_v38, %v1186_v34 }
 0x4a7   : > { %v1173_v40 = vpop.permute.xlu1 %1172  ;;  %v1124_v52 = vpop.permute.xlu0 %1123 }
 0x4a8   : > { %v1178_v57 = vsel %vm380_vm3, %v1173_v40, %v1175_v36 }
 0x4ab   : > { %v1161_v42 = vpop.permute.xlu1 %1160  ;;  %v2224_v56 = vpop.permute.xlu0 %1221 }
 0x4ac   : > { %1257 = vrot.lane.b32.xlu1 %v1161_v42, %s1695_s19 }
 0x4af   : > { %v1152_v43 = vpop.permute.xlu1 %1151  ;;  %v1193_v60 = vpop.permute.xlu0 %1192 }
 0x4b0   : > { %1249 = vrot.lane.b32.xlu1 %v1152_v43, %s1695_s19  ;;  %v1199_v6 = vsel %vm404_vm1, %v1193_v60, %v1195_v37 }
 0x4b3   : > { %v2209_v46 = vpop.permute.xlu1 %1140  ;;  %v1182_v1 = vpop.permute.xlu0 %1181 }
 0x4b4   : > { %1241 = vrot.lane.b32.xlu1 %v2209_v46, %s1695_s19  ;;  %v1188_v8 = vsel %vm392_vm2, %v1182_v1, %v1184_v38 }
 0x4b7   : > { %v1191_v48 = vpop.permute.xlu1 %1190  ;;  %v1171_v2 = vpop.permute.xlu0 %1170 }
 0x4b8   : > { %1275 = vrot.lane.b32.xlu0 %v1191_v48, %s1695_s19  ;;  %1283 = vrot.lane.b32.xlu1 %v1202_v47, %s1695_s19  ;;  %v1198_v7 = vsel %vm404_vm1, %v1191_v48, %v1193_v60  ;;  %v1177_v12 = vsel %vm380_vm3, %v1171_v2, %v1173_v40 }
 0x4bb   : > { %v1180_v50 = vpop.permute.xlu1 %1179  ;;  %v1159_v11 = vpop.permute.xlu0 %1158 }
 0x4bc   : > { %1267 = vrot.lane.b32.xlu0 %v1180_v50, %s1695_s19  ;;  %1289 = vrot.lane.b32.xlu1 %v1211_v49, %s1695_s19  ;;  %v1187_v10 = vsel %vm392_vm2, %v1180_v50, %v1182_v1  ;;  %v1163_v17 = vsel %vm365_vm4, %v1159_v11, %v1161_v42 }
 0x4bf   : > { %v1169_v53 = vpop.permute.xlu1 %1168  ;;  %v1150_v16 = vpop.permute.xlu0 %1149 }
 0x4c0   : > { %1259 = vrot.lane.b32.xlu0 %v1169_v53, %s1695_s19  ;;  %1281 = vrot.lane.b32.xlu1 %v1200_v51, %s1695_s19  ;;  %v1176_v15 = vsel %vm380_vm3, %v1169_v53, %v1171_v2  ;;  %v1155_v19 = vsel %vm355_vm5, %v1150_v16, %v1152_v43 }
 0x4c3   : > { %v1157_v55 = vpop.permute.xlu1 %1156  ;;  %v1139_v22 = vpop.permute.xlu0 %1138 }
 0x4c4   : > { %1251 = vrot.lane.b32.xlu0 %v1157_v55, %s1695_s19  ;;  %1273 = vrot.lane.b32.xlu1 %v1189_v54, %s1695_s19  ;;  %v1162_v14 = vsel %vm365_vm4, %v1157_v55, %v1159_v11  ;;  %v1144_v45 = vsel %vm343_vm6, %v1139_v22, %v2209_v46 }
 0x4c7   : > { %v1148_v58 = vpop.permute.xlu1 %1147  ;;  %v1128_v25 = vpop.permute.xlu0 %1127 }
 0x4c8   : > { %v1153_v59 = vsel %vm355_vm5, %v1146_v39, %v1148_v58  ;;  %1265 = vrot.lane.b32.xlu1 %v1178_v57, %s1695_s19  ;;  %v1154_v21 = vsel %vm355_vm5, %v1148_v58, %v1150_v16 }
 0x4c9   : > { %1243 = vrot.lane.b32.xlu0 %v1153_v59, %s1695_s19 }
 0x4cb   : > { %v1137_v61 = vpop.permute.xlu1 %1136 }
 0x4cc   : > { %v1142_v63 = vsel %vm343_vm6, %v1135_v41, %v1137_v61  ;;  %v1143_v23 = vsel %vm343_vm6, %v1137_v61, %v1139_v22 }
 0x4cd   : > { %1235 = vrot.lane.b32.xlu0 %v1142_v63, %s1695_s19 }
 0x4cf   : > { %v1126_v62 = vpop.permute.xlu1 %1125 }
 0x4d0   : > { %v1131_v0 = vsel %vm331_vm7, %v1124_v52, %v1126_v62  ;;  %v1132_v26 = vsel %vm331_vm7, %v1126_v62, %v1128_v25 }
 0x4d1   : > { %1227 = vrot.lane.b32.xlu0 %v1131_v0, %s1695_s19 }
 0x4d3   : > { %v1204_v3 = vpop.permute.xlu1 %1203 }
 0x4d4   : > { %v1209_v4 = vsel %vm416_vm0, %v1202_v47, %v1204_v3  ;;  %v1210_v5 = vsel %vm416_vm0, %v1204_v3, %v1206_v44 }
 0x4d5   : > { %1285 = vrot.lane.b32.xlu1 %v1209_v4, %s1695_s19  ;;  %1287 = vrot.lane.b32.xlu0 %v1210_v5, %s1695_s19 }
 0x4d7   : > { %v1130_v24 = vpop.permute.xlu1 %1129 }
 0x4d8   : > { %v1133_v27 = vsel %vm331_vm7, %v1128_v25, %v1130_v24  ;;  %v1212_v25 = vld [vmem:[%s2340_s6] sm:$0xff] }
 0x4d9   : > { %1279 = vrot.lane.b32.xlu1 %v1199_v6, %s1695_s19  ;;  %1277 = vrot.lane.b32.xlu0 %v1198_v7, %s1695_s19 }
 0x4db   : > { %v2275_v29 = vpop.permute.xlu1 %1223 }
 0x4dd   : > { %1271 = vrot.lane.b32.xlu1 %v1188_v8, %s1695_s19  ;;  %1269 = vrot.lane.b32.xlu0 %v1187_v10, %s1695_s19 }
 0x4e1   : > { %1263 = vrot.lane.b32.xlu1 %v1177_v12, %s1695_s19  ;;  %1261 = vrot.lane.b32.xlu0 %v1176_v15, %s1695_s19 }
 0x4e5   : > { %1255 = vrot.lane.b32.xlu1 %v1163_v17, %s1695_s19  ;;  %1253 = vrot.lane.b32.xlu0 %v1162_v14, %s1695_s19 }
 0x4e9   : > { %1247 = vrot.lane.b32.xlu1 %v1155_v19, %s1695_s19  ;;  %1245 = vrot.lane.b32.xlu0 %v1154_v21, %s1695_s19 }
 0x4ed   : > { %1239 = vrot.lane.b32.xlu1 %v1144_v45, %s1695_s19  ;;  %1237 = vrot.lane.b32.xlu0 %v1143_v23, %s1695_s19  ;;  %v1292_v45 = vsel %vm499_vm9, %v2224_v56, %v2275_v29 }
 0x4f1   : > { %1231 = vrot.lane.b32.xlu1 %v1133_v27, %s1695_s19  ;;  %1229 = vrot.lane.b32.xlu0 %v1132_v26, %s1695_s19 }
 0x4f5   : > { %1233 = vrot.lane.b32.xlu1 %v1130_v24, %s1695_s19  ;;  %1219 = vrot.lane.b32.xlu0 %v1696_v35, %s1695_s19 }
 0x4f9   : > { %1216 = vperm.xlu1 %1677, %v1213_v28   ;;  %1225 = vrot.lane.b32.xlu0 %v2167_v30, %s1695_s19 }
 0x51e   : > { %v1258_v18 = vpop.permute.xlu1 %1257 }
 0x522   : > { %v1250_v31 = vpop.permute.xlu1 %1249 }
 0x526   : > { %v2277_v32 = vpop.permute.xlu1 %1241 }
 0x52a   : > { %v1276_v9 = vpop.permute.xlu0 %1275  ;;  %v1284_v13 = vpop.permute.xlu1 %1283 }
 0x52e   : > { %v1268_v20 = vpop.permute.xlu0 %1267  ;;  %v1290_v33 = vpop.permute.xlu1 %1289 }
 0x532   : > { %v1260_v34 = vpop.permute.xlu0 %1259  ;;  %v1282_v37 = vpop.permute.xlu1 %1281 }
 0x536   : > { %v1252_v36 = vpop.permute.xlu0 %1251  ;;  %v1274_v39 = vpop.permute.xlu1 %1273 }
 0x53a   : > { %v1266_v41 = vpop.permute.xlu1 %1265 }
 0x53b   : > { %v1244_v38 = vpop.permute.xlu0 %1243 }
 0x53f   : > { %v1236_v40 = vpop.permute.xlu0 %1235 }
 0x543   : > { %v2279_v42 = vpop.permute.xlu0 %1227 }
 0x547   : > { %v1286_v30 = vpop.permute.xlu1 %1285  ;;  %v1288_v43 = vpop.permute.xlu0 %1287 }
 0x548   : > { %v1315_v44 = vsel %vm499_vm9, %v1284_v13, %v1286_v30  ;;  %v1317_v46 = vsel %vm499_vm9, %v1288_v43, %v1290_v33  ;;  %v1316_v47 = vsel %vm499_vm9, %v1286_v30, %v1288_v43 }
 0x549   : > { %1362 = vmatprep.subr.mxu0 %v1316_v47  ;;  %1635 = vmatpush3.msra.mxu1 %v1317_v46 }
 0x54a   : > { %1363 = vmatpush1.msra.mxu0 %v1315_v44  ;;  %1636 = vmatprep.subr.mxu1 %v1696_v35 }
 0x54b   : > { %v1280_v48 = vpop.permute.xlu1 %1279  ;;  %v1278_v49 = vpop.permute.xlu0 %1277 }
 0x54c   : > { %v1314_v50 = vsel %vm499_vm9, %v1280_v48, %v1282_v37  ;;  %v1312_v51 = vsel %vm499_vm9, %v1276_v9, %v1278_v49  ;;  %v1313_v52 = vsel %vm499_vm9, %v1278_v49, %v1280_v48 }
 0x54d   : > { %1364 = vmatprep.subr.mxu0 %v1313_v52  ;;  %1637 = vmatpush3.msra.mxu1 %v1314_v50 }
 0x54e   : > { %1365 = vmatpush1.msra.mxu0 %v1312_v51  ;;  %1638 = vmatprep.subr.mxu1 %v1696_v35 }
 0x54f   : > { %v1272_v53 = vpop.permute.xlu1 %1271  ;;  %v1270_v54 = vpop.permute.xlu0 %1269 }
 0x550   : > { %v1311_v55 = vsel %vm499_vm9, %v1272_v53, %v1274_v39  ;;  %v1309_v57 = vsel %vm499_vm9, %v1268_v20, %v1270_v54  ;;  %v1310_v58 = vsel %vm499_vm9, %v1270_v54, %v1272_v53 }
 0x551   : > { %1366 = vmatprep.subr.mxu0 %v1310_v58  ;;  %1639 = vmatpush3.msra.mxu1 %v1311_v55 }
 0x552   : > { %1367 = vmatpush1.msra.mxu0 %v1309_v57  ;;  %1640 = vmatprep.subr.mxu1 %v1696_v35 }
 0x553   : > { %v1264_v59 = vpop.permute.xlu1 %1263  ;;  %v1262_v60 = vpop.permute.xlu0 %1261 }
 0x554   : > { %v1308_v61 = vsel %vm499_vm9, %v1264_v59, %v1266_v41  ;;  %v1306_v63 = vsel %vm499_vm9, %v1260_v34, %v1262_v60  ;;  %v1307_v62 = vsel %vm499_vm9, %v1262_v60, %v1264_v59 }
 0x555   : > { %1368 = vmatprep.subr.mxu0 %v1307_v62  ;;  %1641 = vmatpush3.msra.mxu1 %v1308_v61 }
 0x556   : > { %1369 = vmatpush1.msra.mxu0 %v1306_v63  ;;  %1642 = vmatprep.subr.mxu1 %v1696_v35 }
 0x557   : > { %v1256_v0 = vpop.permute.xlu1 %1255  ;;  %v1254_v1 = vpop.permute.xlu0 %1253 }
 0x558   : > { %v1305_v3 = vsel %vm499_vm9, %v1256_v0, %v1258_v18  ;;  %v1303_v4 = vsel %vm499_vm9, %v1252_v36, %v1254_v1  ;;  %v1304_v5 = vsel %vm499_vm9, %v1254_v1, %v1256_v0 }
 0x559   : > { %1370 = vmatprep.subr.mxu0 %v1304_v5  ;;  %1643 = vmatpush3.msra.mxu1 %v1305_v3 }
 0x55a   : > { %1371 = vmatpush1.msra.mxu0 %v1303_v4  ;;  %1644 = vmatprep.subr.mxu1 %v1696_v35 }
 0x55b   : > { %v1248_v2 = vpop.permute.xlu1 %1247  ;;  %v1246_v6 = vpop.permute.xlu0 %1245 }
 0x55c   : > { %v1302_v7 = vsel %vm499_vm9, %v1248_v2, %v1250_v31  ;;  %v1300_v8 = vsel %vm499_vm9, %v1244_v38, %v1246_v6  ;;  %v1301_v10 = vsel %vm499_vm9, %v1246_v6, %v1248_v2 }
 0x55d   : > { %1372 = vmatprep.subr.mxu0 %v1301_v10  ;;  %1645 = vmatpush3.msra.mxu1 %v1302_v7 }
 0x55e   : > { %1373 = vmatpush1.msra.mxu0 %v1300_v8  ;;  %1646 = vmatprep.subr.mxu1 %v1696_v35 }
 0x55f   : > { %v1240_v11 = vpop.permute.xlu1 %1239  ;;  %v1238_v12 = vpop.permute.xlu0 %1237 }
 0x560   : > { %v1299_v15 = vsel %vm499_vm9, %v1240_v11, %v2277_v32  ;;  %v1297_v16 = vsel %vm499_vm9, %v1236_v40, %v1238_v12  ;;  %v1298_v17 = vsel %vm499_vm9, %v1238_v12, %v1240_v11 }
 0x561   : > { %1374 = vmatprep.subr.mxu0 %v1298_v17  ;;  %1647 = vmatpush3.msra.mxu1 %v1299_v15 }
 0x562   : > { %1375 = vmatpush1.msra.mxu0 %v1297_v16  ;;  %1648 = vmatprep.subr.mxu1 %v1696_v35 }
 0x563   : > { %v1232_v14 = vpop.permute.xlu1 %1231  ;;  %v1230_v19 = vpop.permute.xlu0 %1229 }
 0x564   : > { %v1294_v21 = vsel %vm499_vm9, %v2279_v42, %v1230_v19  ;;  %v1295_v22 = vsel %vm499_vm9, %v1230_v19, %v1232_v14 }
 0x565   : > { %1376 = vmatprep.subr.mxu0 %v1295_v22 }
 0x566   : > { %1377 = vmatpush1.msra.mxu0 %v1294_v21 }
 0x567   : > { %v1234_v23 = vpop.permute.xlu1 %1233  ;;  %1378 = vmatprep.subr.mxu0 %v1292_v45  ;;  %v1220_v24 = vpop.permute.xlu0 %1219 }
 0x568   : > { %v1296_v26 = vsel %vm499_vm9, %v1232_v14, %v1234_v23  ;;  %v1291_v27 = vsel %vm499_vm9, %v1220_v24, %v2224_v56 }
 0x569   : > { %1379 = vmatpush1.msra.mxu0 %v1291_v27  ;;  %1649 = vmatpush3.msra.mxu1 %v1296_v26 }
 0x56a   : > { %1558 = vmatmul.mubr.msk.f32.vlgmr.msra.gmra.mxu0 %vm554_vm10, %v1212_v25  ;;  %1650 = vmatprep.subr.mxu1 %v1696_v35 }
 0x56b   : > { %v1226_v28 = vpop.permute.xlu0 %1225 }
 0x56c   : > { %v1293_v18 = vsel %vm499_vm9, %v2275_v29, %v1226_v28 }
 0x56d   : > { %1651 = vmatpush3.msra.mxu1 %v1293_v18 }
 0x56e   : > { %1653 = vmatmul.mubr.msk.f32.vlgmr.msra.gmra.mxu1 %vm554_vm10, %v1212_v25 }
 0x574   : > { %v1217_v31 = vpop.permute.xlu1 %1216 }
 0x62a   : > { %v1414_v56 = vpop.f32.mrf.mxu0 }
 0x62b   : > { %v1415_v32 = vadd.f32 %v1414_v56, %v1217_v31 }
 0x62c   : > { %v1416_v9 = vpop.f32.mrf.mxu0 }
 0x62d   : > { %1489 = vst [vmem:[%s305_s17] sm:$0xff] %v1415_v32  ;;  %v1417_v13 = vadd.f32 %v1416_v9, %v1217_v31 }
 0x62e   : > { %v1485_v20 = vpop.f32.mrf.mxu1 }
 0x62f   : > { %1490 = vst [vmem:[%s305_s17 + $0x8] sm:$0xff] %v1417_v13  ;;  %v1486_v35 = vadd.f32 %v1485_v20, %v1217_v31 }
 0x630   : > { %v1654_v33 = vpop.f32.mrf.mxu1 }
 0x631   : > { %1491 = vst [vmem:[%s305_s17 + $0x10] sm:$0xff] %v1486_v35 }
 0x632 PF: > { %s18_s27 = sadd.s32 1, %s1685_s27  }
 0x633   : > { %p15_p4 = scmp.ge.s32.totalorder %s18_s27, 4  }
 0x635   :  { %17 = sbr.rel (!%p15_p4) target bundleno = 1 (0x1), region = 82 }

</bundles_post_ra>
